<compile_context>
chip_gen: v6e
topology: v6e:2x2x1
jax: 0.10.0
libtpu: 0.0.40
codegen_flags: <defaults>
</compile_context>

<pallas_src>
import jax
import jax.numpy as jnp
from jax import lax
from jax.experimental import pallas as pl
from jax.experimental.pallas import tpu as pltpu

# ----------------------------- configuration -------------------------------
B = 2            # batch_size
P_LEN = 8        # paragraph (context) length
Q_LEN = 8        # question length
VOCAB = 50       # pretrained embedding rows
EMB = 16         # embedding_dim
N_NER = 4        # len(dl.ner_voc)
N_POS = 5        # len(dl.pos_voc)
HIDDEN = 32      # hidden_size
DIV = 2          # (1 + bidirectional) * n_layers
H = HIDDEN // DIV                        # 16 per direction
GATES = 16 * H                           # 256: fused [par_f,par_b,q_f,q_b] x [i,f,g,o]
PAR_EMB = EMB + N_NER + N_POS + EMB + 1  # 42
FC_IN = 4 * HIDDEN                       # 128

assert P_LEN == Q_LEN, "fused recurrence assumes equal paragraph/question length"

# packed-slab row offsets (all matmul operands start on 8-row boundaries)
VOCAB_PAD = 56
R_MPAR, R_MQ, R_WSOFT, R_WHH = 0, 56, 112, 128
R_WMATCH, R_BIAS, R_FWDM = 192, 193, 194            # single broadcast rows
MW = 32                                             # misc slab lane width
M_ATT, M_SELPQ, M_SELQ = 0, 56, 72
M_FC1W, M_FC1B, M_FC2W, M_FC2B = 80, 208, 216, 248

_VMEM = pl.BlockSpec(memory_space=pltpu.MemorySpace.VMEM)


# ------------------------------ Pallas kernel -------------------------------
def drqa_kernel(ids_ref, w256_ref, misc_ref, out_ref):
    f32 = jnp.float32
    TB = P_LEN * B
    NV = VOCAB_PAD
    G = 4 * H                                   # per-gate chunk width (64 lanes)

    ids = ids_ref[...]                          # (TB, 2) int32, row = t*B + b
    ctx_ids = ids[:, 0:1]
    qst_ids = ids[:, 1:2]

    # --- static views into the packed weight slabs (zero-cost slicing) ---
    m_par   = w256_ref[R_MPAR:R_MPAR + NV, :]        # (56, 256) par input-proj table
    m_q     = w256_ref[R_MQ:R_MQ + NV, :]            # (56, 256) query input-proj table
    w_soft  = w256_ref[R_WSOFT:R_WSOFT + EMB, :]     # (16, 256) aligned-attn projection
    whh     = w256_ref[R_WHH:R_WHH + 4 * H, :]       # (64, 256) block recurrent weights
    w_match = w256_ref[R_WMATCH:R_WMATCH + 1, :]     # (1, 256)
    bias    = w256_ref[R_BIAS:R_BIAS + 1, :]         # (1, 256) combined LSTM biases
    fwd_m   = w256_ref[R_FWDM:R_FWDM + 1, :] > 0.5   # (1, 256) fwd-direction lane mask

    att_tab = misc_ref[M_ATT:M_ATT + NV, 0:EMB + 1]  # (56, 17) [relu(a)*emb | relu(a)]
    selpq   = misc_ref[M_SELPQ:M_SELPQ + TB, 0:TB]   # (16, 16) same-batch row selector
    selq    = misc_ref[M_SELQ:M_SELQ + B, 0:TB]      # (2, 16)  batch selector
    fc1_w   = misc_ref[M_FC1W:M_FC1W + FC_IN, :]     # (128, 32)
    fc1_b   = misc_ref[M_FC1B:M_FC1B + 1, :]         # (1, 32)
    fc2_w   = misc_ref[M_FC2W:M_FC2W + HIDDEN, 0:2]  # (32, 2)
    fc2_b   = misc_ref[M_FC2B:M_FC2B + 1, 0:2]       # (1, 2)

    # --- token one-hots (gather-as-matmul; padded vocab cols 50..55 never hit) ---
    ctx_oh = (ctx_ids == lax.broadcasted_iota(jnp.int32, (TB, NV), 1)).astype(f32)
    qst_oh = (qst_ids == lax.broadcasted_iota(jnp.int32, (TB, NV), 1)).astype(f32)

    # --- aligned question attention (exact simplification of f_align_4_pars):
    # exp(alpha(p)) is a positive per-paragraph-token scalar that cancels between
    # numerator and denominator, so the aligned vector depends only on the
    # question row.  The per-token factors relu(alpha(q)) and relu(alpha(q))*emb(q)
    # were folded into att_tab over the vocab, so numerator and denominator come
    # out of ONE matmul (the reference divides by the same sum; its 0/0 corner is
    # unreachable with this positive alpha bias).
    qcnt = jnp.dot(selq, qst_oh, preferred_element_type=f32)           # (B, 56) counts
    nd = jnp.dot(qcnt, att_tab, preferred_element_type=f32)            # (B, 17)
    aligned = nd[:, 0:EMB] / nd[:, EMB:EMB + 1]                        # (B, 16)

    # --- exact-match feature: ctx token present in its own batch's question ---
    cnt_rows = jnp.dot(selpq, qst_oh, preferred_element_type=f32)      # (16, 56)
    match = (jnp.sum(ctx_oh * cnt_rows, axis=1, keepdims=True) > 0.0).astype(f32)

    # --- fused gate-input slab for BOTH BiLSTMs (g columns pre-scaled by 2) ---
    gin = (jnp.dot(ctx_oh, m_par, preferred_element_type=f32)
           + jnp.dot(qst_oh, m_q, preferred_element_type=f32)
           + match * w_match)                                          # (16, 256)
    row_const = jnp.dot(aligned, w_soft, preferred_element_type=f32) + bias   # (B, 256)

    # Per-step gate inputs: forward lanes read step t, backward lanes read step
    # T-1-t.  These do not depend on h/c, so the whole list is free filler under
    # the recurrence's serial MXU latency.
    T = P_LEN
    gi = [jnp.where(fwd_m,
                    gin[t * B:(t + 1) * B, :],
                    gin[(T - 1 - t) * B:(T - t) * B, :]) + row_const
          for t in range(T)]

    # --- fused recurrence: one (B,64)@(64,256) MXU op + 2 EUP passes per step ---
    h = jnp.zeros((B, 4 * H), f32)       # [h_par_f | h_par_b | h_q_f | h_q_b]
    c = jnp.zeros((B, 4 * H), f32)
    for t in range(T):                   # static unroll (T = 8)
        if t == 0:
            gates = gi[0]                # h == 0 -> skip the recurrent matmul
        else:
            gates = gi[t] + jnp.dot(h, whh, preferred_element_type=f32)
        s = jax.nn.sigmoid(gates)        # one EUP pass over all 256 gate lanes
        i = s[:, 0 * G:1 * G]
        f = s[:, 1 * G:2 * G]
        g = 2.0 * s[:, 2 * G:3 * G] - 1.0    # tanh(g) = 2*sigmoid(2g) - 1 (exact)
        o = s[:, 3 * G:4 * G]
        c = f * c + i * g
        h = o * jnp.tanh(c)

    # res columns = [h_pf h_pb h_qf h_qb | c_pf c_pb c_qf c_qb]; fc1_w rows were
    # permuted in pack_params so this matches torch's [h_p | c_p | h_q | c_q]
    # ordering of fc1's input.
    res = jnp.concatenate([h, c], axis=1)                              # (B, 128)
    h1 = jnp.dot(res, fc1_w, preferred_element_type=f32) + fc1_b
    # TODO(synk): nn.Dropout(dropout_fc) is identity at inference / p=0; no RNG here.
    out = jnp.dot(h1, fc2_w, preferred_element_type=f32) + fc2_b
    out_ref[...] = out.astype(out_ref.dtype)


# --------------------------------- parameters -------------------------------
def init_params(key):
    """PyTorch-equivalent parameters (weights stored transposed: (in, out))."""
    ks = jax.random.split(key, 8)
    n = lambda k, shape, s=0.1: jax.random.normal(k, shape, jnp.float32) * s

    params = {}
    params["emb"] = n(ks[0], (VOCAB, EMB), 0.5)              # frozen pretrained table
    params["alpha_w"] = n(ks[1], (1, EMB), 0.1)              # Linear(EMB, 1).weight
    params["alpha_b"] = jnp.full((1, 1), 1.0, jnp.float32)   # positive bias -> summ > 0

    def lstm_params(kbase, in_dim):
        kk = jax.random.split(kbase, 8)
        out = {}
        for d, tag in enumerate(["f", "b"]):
            wih = n(kk[4 * d + 0], (4 * H, in_dim), 0.1)     # torch weight_ih (i,f,g,o)
            whh = n(kk[4 * d + 1], (4 * H, H), 0.1)          # torch weight_hh
            b_ih = n(kk[4 * d + 2], (4 * H,), 0.1)
            b_hh = n(kk[4 * d + 3], (4 * H,), 0.1)
            out["wih_" + tag] = wih.T                        # (in, 4H)
            out["whh_" + tag] = whh.T                        # (H, 4H)
            out["b_" + tag] = (b_ih + b_hh).reshape(1, 4 * H)
        return out

    params["lstm_par"] = lstm_params(ks[2], PAR_EMB)
    params["lstm_qry"] = lstm_params(ks[3], EMB)

    params["fc1_w"] = n(ks[4], (HIDDEN, FC_IN), 0.1).T       # (FC_IN, HIDDEN)
    params["fc1_b"] = n(ks[5], (1, HIDDEN), 0.1)
    params["fc2_w"] = n(ks[6], (2, HIDDEN), 0.1).T           # (HIDDEN, 2)
    params["fc2_b"] = n(ks[7], (1, 2), 0.1)
    return params


def pack_params(p):
    """One-time repack of torch-layout params into the 3 fused-kernel slabs."""
    f32 = jnp.float32
    lp, lq = p["lstm_par"], p["lstm_qry"]

    def fuse_cols(srcs):
        # srcs: per unit [par_f, par_b, q_f, q_b], each (rows, 4H) in torch gate
        # order [i|f|g|o] or None.  Returns (rows, 16H) laid out
        # [i:(pf,pb,qf,qb) | f:... | g:... | o:...].
        rows = next(s.shape[0] for s in srcs if s is not None)
        z = jnp.zeros((rows, H), f32)
        blocks = []
        for k in range(4):
            blocks.append(jnp.concatenate(
                [z if s is None else s[:, k * H:(k + 1) * H] for s in srcs], axis=1))
        return jnp.concatenate(blocks, axis=1)

    # --- fold embedding / NER / POS lookups into per-token vocab tables ---
    ids = jnp.arange(VOCAB)
    # TODO(synk): dl.ind2ner / dl.ind2pos are host dicts; synthesized as id % |voc|.
    ner_tab = jax.nn.one_hot(ids % N_NER, N_NER, dtype=f32)
    pos_tab = jax.nn.one_hot(ids % N_POS, N_POS, dtype=f32)
    o_ner, o_pos = EMB, EMB + N_NER
    o_soft, o_match = EMB + N_NER + N_POS, EMB + N_NER + N_POS + EMB

    def fold_par(wih):   # (PAR_EMB, 4H) -> (VOCAB, 4H) per-token table
        return (jnp.dot(p["emb"], wih[0:EMB])
                + jnp.dot(ner_tab, wih[o_ner:o_pos])
                + jnp.dot(pos_tab, wih[o_pos:o_soft]))

    m_par   = fuse_cols([fold_par(lp["wih_f"]), fold_par(lp["wih_b"]), None, None])
    w_soft  = fuse_cols([lp["wih_f"][o_soft:o_match], lp["wih_b"][o_soft:o_match],
                         None, None])
    w_match = fuse_cols([lp["wih_f"][o_match:], lp["wih_b"][o_match:], None, None])
    m_q     = fuse_cols([None, None,
                         jnp.dot(p["emb"], lq["wih_f"]), jnp.dot(p["emb"], lq["wih_b"])])
    bias    = fuse_cols([lp["b_f"], lp["b_b"], lq["b_f"], lq["b_b"]])

    # block recurrent weight for packed h = [h_pf | h_pb | h_qf | h_qb] -> (4H, 16H)
    whh_rows = []
    for u, w in enumerate([lp["whh_f"], lp["whh_b"], lq["whh_f"], lq["whh_b"]]):
        srcs = [None] * 4
        srcs[u] = w
        whh_rows.append(fuse_cols(srcs))
    whh = jnp.concatenate(whh_rows, axis=0)                  # (64, 256)

    # pre-scale g-gate columns by 2 so tanh(g) = 2*sigmoid(2g)-1 in-kernel (exact)
    gscale = jnp.concatenate([jnp.ones((1, 8 * H), f32),
                              jnp.full((1, 4 * H), 2.0, f32),
                              jnp.ones((1, 4 * H), f32)], axis=1)
    m_par, m_q, w_soft, w_match, bias, whh = [
        t * gscale for t in (m_par, m_q, w_soft, w_match, bias, whh)]

    fwd_mask = jnp.tile(jnp.concatenate(
        [jnp.ones((1, H), f32), jnp.zeros((1, H), f32),
         jnp.ones((1, H), f32), jnp.zeros((1, H), f32)], axis=1), (1, 4))   # (1, 256)

    def pad(a, rows, cols):
        r, c = a.shape
        if c < cols:
            a = jnp.concatenate([a, jnp.zeros((r, cols - c), f32)], axis=1)
        if r < rows:
            a = jnp.concatenate([a, jnp.zeros((rows - r, cols), f32)], axis=0)
        return a

    # --- slab 1: every 256-lane-wide table; matmul operands on 8-row boundaries ---
    w256 = jnp.concatenate([
        pad(m_par, VOCAB_PAD, GATES),     # rows   0.. 55  (R_MPAR)
        pad(m_q, VOCAB_PAD, GATES),       # rows  56..111  (R_MQ)
        w_soft,                           # rows 112..127  (R_WSOFT)
        whh,                              # rows 128..191  (R_WHH)
        w_match,                          # row  192       (R_WMATCH)
        bias,                             # row  193       (R_BIAS)
        fwd_mask,                         # row  194       (R_FWDM)
    ], axis=0)                            # (195, 256)

    # --- attention table: relu(alpha(q)) per token and its emb-weighted version ---
    qlin = jnp.maximum(jnp.dot(p["emb"], p["alpha_w"].T) + p["alpha_b"], 0.0)  # (V,1)
    att_tab = jnp.concatenate([qlin * p["emb"], qlin], axis=1)                 # (V,17)

    selq = jnp.tile(jnp.eye(B, dtype=f32), (1, Q_LEN))                         # (B, Q*B)
    selpq = jnp.dot(jnp.tile(jnp.eye(B, dtype=f32), (P_LEN, 1)), selq)         # (P*B, Q*B)

    # fc1 rows permuted so the kernel's res = [h_p | h_q | c_p | c_q] matches
    # torch's [h_p | c_p | h_q | c_q] fc1 input ordering.
    perm = jnp.concatenate([jnp.arange(0, 2 * H), jnp.arange(4 * H, 6 * H),
                            jnp.arange(2 * H, 4 * H), jnp.arange(6 * H, 8 * H)])
    fc1_w = p["fc1_w"][perm, :]

    # --- slab 2: everything narrower than 256 lanes, packed at width 32 ---
    misc = jnp.concatenate([
        pad(att_tab, VOCAB_PAD, MW),      # rows   0.. 55  (M_ATT)
        pad(selpq, P_LEN * B, MW),        # rows  56.. 71  (M_SELPQ)
        pad(selq, 8, MW),                 # rows  72.. 79  (M_SELQ)
        pad(fc1_w, FC_IN, MW),            # rows  80..207  (M_FC1W)
        pad(p["fc1_b"], 8, MW),           # rows 208..215  (M_FC1B)
        pad(p["fc2_w"], HIDDEN, MW),      # rows 216..247  (M_FC2W)
        pad(p["fc2_b"], 8, MW),           # rows 248..255  (M_FC2B)
    ], axis=0)                            # (256, 32)

    return {"w256": w256, "misc": misc}


# --------------------------------- forward ----------------------------------
def drqa_forward(context_word, question_word, kp):
    # batch.context_word / question_word arrive (seq_len, batch) = time-major,
    # which is exactly the row order the fused recurrence consumes; merge the two
    # id streams into a single (T*B, 2) int32 array (one DMA).
    ids = jnp.stack([context_word.reshape(-1), question_word.reshape(-1)],
                    axis=1).astype(jnp.int32)
    # TODO(synk): for a batched-serving workload, add a leading "parallel" grid
    # axis over example tiles so both v7x TensorCores are used; a single tiny
    # example stays grid-less.
    return pl.pallas_call(
        drqa_kernel,
        out_shape=jax.ShapeDtypeStruct((B, 2), jnp.float32),
        in_specs=[_VMEM, _VMEM, _VMEM],
        out_specs=_VMEM,
    )(ids, kp["w256"], kp["misc"])


# ----------------------------------- main ------------------------------------
if __name__ == "__main__":
    root = jax.random.PRNGKey(0)
    k_ctx, k_qst, k_par = jax.random.split(root, 3)

    context_word = jax.random.randint(k_ctx, (P_LEN, B), 0, VOCAB, dtype=jnp.int32)
    question_word = jax.random.randint(k_qst, (Q_LEN, B), 0, VOCAB, dtype=jnp.int32)

    params = init_params(k_par)
    kernel_params = pack_params(params)          # one-time weight repack

    fwd = jax.jit(drqa_forward)
    out = jax.block_until_ready(fwd(context_word, question_word, kernel_params))

    assert out.shape == (B, 2), out.shape
    assert bool(jnp.all(jnp.isfinite(out)))
    print("KERNEL_OK")
</pallas_src>

<mosaic_0001>
module attributes {stable_mosaic.version = 11 : i64} {
  func.func @drqa_kernel(%arg0: memref<16x2xi32, #tpu.memory_space<vmem>>, %arg1: memref<195x256xf32, #tpu.memory_space<vmem>>, %arg2: memref<256x32xf32, #tpu.memory_space<vmem>>, %arg3: memref<2x2xf32, #tpu.memory_space<vmem>>) attributes {dimension_semantics = [], scalar_prefetch = 0 : i64, scratch_operands = 0 : i64, tpu.core_type = #tpu.core_type<tc>} {
    %c0 = arith.constant 0 : index
    %c0_0 = arith.constant 0 : index
    %0 = vector.load %arg0[%c0, %c0_0] : memref<16x2xi32, #tpu.memory_space<vmem>>, vector<16x2xi32>
    %1 = vector.extract_strided_slice %0 {offsets = [0, 0], sizes = [16, 1], strides = [1, 1]} : vector<16x2xi32> to vector<16x1xi32>
    %2 = vector.extract_strided_slice %0 {offsets = [0, 1], sizes = [16, 1], strides = [1, 1]} : vector<16x2xi32> to vector<16x1xi32>
    %c0_1 = arith.constant 0 : index
    %c0_2 = arith.constant 0 : index
    %3 = vector.load %arg1[%c0_1, %c0_2] : memref<195x256xf32, #tpu.memory_space<vmem>>, vector<56x256xf32>
    %c56 = arith.constant 56 : index
    %c0_3 = arith.constant 0 : index
    %4 = vector.load %arg1[%c56, %c0_3] : memref<195x256xf32, #tpu.memory_space<vmem>>, vector<56x256xf32>
    %c112 = arith.constant 112 : index
    %c0_4 = arith.constant 0 : index
    %5 = vector.load %arg1[%c112, %c0_4] : memref<195x256xf32, #tpu.memory_space<vmem>>, vector<16x256xf32>
    %c128 = arith.constant 128 : index
    %c0_5 = arith.constant 0 : index
    %6 = vector.load %arg1[%c128, %c0_5] : memref<195x256xf32, #tpu.memory_space<vmem>>, vector<64x256xf32>
    %c192 = arith.constant 192 : index
    %c0_6 = arith.constant 0 : index
    %7 = vector.load %arg1[%c192, %c0_6] : memref<195x256xf32, #tpu.memory_space<vmem>>, vector<1x256xf32>
    %c193 = arith.constant 193 : index
    %c0_7 = arith.constant 0 : index
    %8 = vector.load %arg1[%c193, %c0_7] : memref<195x256xf32, #tpu.memory_space<vmem>>, vector<1x256xf32>
    %c194 = arith.constant 194 : index
    %c0_8 = arith.constant 0 : index
    %9 = vector.load %arg1[%c194, %c0_8] : memref<195x256xf32, #tpu.memory_space<vmem>>, vector<1x256xf32>
    %cst = arith.constant 5.000000e-01 : f32
    %10 = vector.broadcast %cst : f32 to vector<1x256xf32>
    %11 = arith.cmpf ogt, %9, %10 : vector<1x256xf32>
    %c0_9 = arith.constant 0 : index
    %c0_10 = arith.constant 0 : index
    %12 = vector.load %arg2[%c0_9, %c0_10] : memref<256x32xf32, #tpu.memory_space<vmem>>, vector<56x17xf32>
    %c56_11 = arith.constant 56 : index
    %c0_12 = arith.constant 0 : index
    %13 = vector.load %arg2[%c56_11, %c0_12] : memref<256x32xf32, #tpu.memory_space<vmem>>, vector<16x16xf32>
    %c72 = arith.constant 72 : index
    %c0_13 = arith.constant 0 : index
    %14 = vector.load %arg2[%c72, %c0_13] : memref<256x32xf32, #tpu.memory_space<vmem>>, vector<2x16xf32>
    %c80 = arith.constant 80 : index
    %c0_14 = arith.constant 0 : index
    %15 = vector.load %arg2[%c80, %c0_14] : memref<256x32xf32, #tpu.memory_space<vmem>>, vector<128x32xf32>
    %c208 = arith.constant 208 : index
    %c0_15 = arith.constant 0 : index
    %16 = vector.load %arg2[%c208, %c0_15] : memref<256x32xf32, #tpu.memory_space<vmem>>, vector<1x32xf32>
    %c216 = arith.constant 216 : index
    %c0_16 = arith.constant 0 : index
    %17 = vector.load %arg2[%c216, %c0_16] : memref<256x32xf32, #tpu.memory_space<vmem>>, vector<32x2xf32>
    %c248 = arith.constant 248 : index
    %c0_17 = arith.constant 0 : index
    %18 = vector.load %arg2[%c248, %c0_17] : memref<256x32xf32, #tpu.memory_space<vmem>>, vector<1x2xf32>
    %19 = tpu.iota {dimensions = array<i32: 1>} : vector<16x56xi32>
    %20 = vector.broadcast %1 : vector<16x1xi32> to vector<16x56xi32>
    %21 = arith.cmpi eq, %20, %19 : vector<16x56xi32>
    %22 = arith.extui %21 : vector<16x56xi1> to vector<16x56xi32>
    %23 = arith.sitofp %22 : vector<16x56xi32> to vector<16x56xf32>
    %24 = tpu.iota {dimensions = array<i32: 1>} : vector<16x56xi32>
    %25 = vector.broadcast %2 : vector<16x1xi32> to vector<16x56xi32>
    %26 = arith.cmpi eq, %25, %24 : vector<16x56xi32>
    %27 = arith.extui %26 : vector<16x56xi1> to vector<16x56xi32>
    %28 = arith.sitofp %27 : vector<16x56xi32> to vector<16x56xf32>
    %cst_18 = arith.constant dense<0.000000e+00> : vector<2x56xf32>
    %29 = tpu.matmul %14, %28, %cst_18 {dimension_numbers = #tpu.dot_dimension_numbers<[1], [0], [0], [1], [0, 0, 1, 1], [], []>} : vector<2x16xf32>, vector<16x56xf32>, vector<2x56xf32> -> vector<2x56xf32>
    %cst_19 = arith.constant dense<0.000000e+00> : vector<2x17xf32>
    %30 = tpu.matmul %29, %12, %cst_19 {dimension_numbers = #tpu.dot_dimension_numbers<[1], [0], [0], [1], [0, 0, 1, 1], [], []>} : vector<2x56xf32>, vector<56x17xf32>, vector<2x17xf32> -> vector<2x17xf32>
    %31 = vector.extract_strided_slice %30 {offsets = [0, 0], sizes = [2, 16], strides = [1, 1]} : vector<2x17xf32> to vector<2x16xf32>
    %32 = vector.extract_strided_slice %30 {offsets = [0, 16], sizes = [2, 1], strides = [1, 1]} : vector<2x17xf32> to vector<2x1xf32>
    %33 = vector.broadcast %32 : vector<2x1xf32> to vector<2x16xf32>
    %34 = arith.divf %31, %33 : vector<2x16xf32>
    %cst_20 = arith.constant dense<0.000000e+00> : vector<16x56xf32>
    %35 = tpu.matmul %13, %28, %cst_20 {dimension_numbers = #tpu.dot_dimension_numbers<[1], [0], [0], [1], [0, 0, 1, 1], [], []>} : vector<16x16xf32>, vector<16x56xf32>, vector<16x56xf32> -> vector<16x56xf32>
    %36 = arith.mulf %23, %35 : vector<16x56xf32>
    %cst_21 = arith.constant dense<0.000000e+00> : vector<16xf32>
    %37 = vector.multi_reduction <add>, %36, %cst_21 [1] : vector<16x56xf32> to vector<16xf32>
    %38 = vector.shape_cast %37 : vector<16xf32> to vector<16x1xf32>
    %cst_22 = arith.constant 0.000000e+00 : f32
    %39 = vector.broadcast %cst_22 : f32 to vector<16x1xf32>
    %40 = arith.cmpf ogt, %38, %39 : vector<16x1xf32>
    %41 = arith.extui %40 : vector<16x1xi1> to vector<16x1xi32>
    %42 = arith.sitofp %41 : vector<16x1xi32> to vector<16x1xf32>
    %cst_23 = arith.constant dense<0.000000e+00> : vector<16x256xf32>
    %43 = tpu.matmul %23, %3, %cst_23 {dimension_numbers = #tpu.dot_dimension_numbers<[1], [0], [0], [1], [0, 0, 1, 1], [], []>} : vector<16x56xf32>, vector<56x256xf32>, vector<16x256xf32> -> vector<16x256xf32>
    %cst_24 = arith.constant dense<0.000000e+00> : vector<16x256xf32>
    %44 = tpu.matmul %28, %4, %cst_24 {dimension_numbers = #tpu.dot_dimension_numbers<[1], [0], [0], [1], [0, 0, 1, 1], [], []>} : vector<16x56xf32>, vector<56x256xf32>, vector<16x256xf32> -> vector<16x256xf32>
    %45 = arith.addf %43, %44 : vector<16x256xf32>
    %46 = vector.broadcast %42 : vector<16x1xf32> to vector<16x256xf32>
    %47 = vector.broadcast %7 : vector<1x256xf32> to vector<16x256xf32>
    %48 = arith.mulf %46, %47 : vector<16x256xf32>
    %49 = arith.addf %45, %48 : vector<16x256xf32>
    %cst_25 = arith.constant dense<0.000000e+00> : vector<2x256xf32>
    %50 = tpu.matmul %34, %5, %cst_25 {dimension_numbers = #tpu.dot_dimension_numbers<[1], [0], [0], [1], [0, 0, 1, 1], [], []>} : vector<2x16xf32>, vector<16x256xf32>, vector<2x256xf32> -> vector<2x256xf32>
    %51 = vector.broadcast %8 : vector<1x256xf32> to vector<2x256xf32>
    %52 = arith.addf %50, %51 : vector<2x256xf32>
    %53 = vector.extract_strided_slice %49 {offsets = [0, 0], sizes = [2, 256], strides = [1, 1]} : vector<16x256xf32> to vector<2x256xf32>
    %54 = vector.extract_strided_slice %49 {offsets = [14, 0], sizes = [2, 256], strides = [1, 1]} : vector<16x256xf32> to vector<2x256xf32>
    %55 = vector.shape_cast %11 : vector<1x256xi1> to vector<1x256xi1>
    %56 = vector.broadcast %55 : vector<1x256xi1> to vector<2x256xi1>
    %57 = arith.select %56, %53, %54 : vector<2x256xi1>, vector<2x256xf32>
    %58 = arith.addf %57, %52 : vector<2x256xf32>
    %59 = vector.extract_strided_slice %49 {offsets = [2, 0], sizes = [2, 256], strides = [1, 1]} : vector<16x256xf32> to vector<2x256xf32>
    %60 = vector.extract_strided_slice %49 {offsets = [12, 0], sizes = [2, 256], strides = [1, 1]} : vector<16x256xf32> to vector<2x256xf32>
    %61 = vector.shape_cast %11 : vector<1x256xi1> to vector<1x256xi1>
    %62 = vector.broadcast %61 : vector<1x256xi1> to vector<2x256xi1>
    %63 = arith.select %62, %59, %60 : vector<2x256xi1>, vector<2x256xf32>
    %64 = arith.addf %63, %52 : vector<2x256xf32>
    %65 = vector.extract_strided_slice %49 {offsets = [4, 0], sizes = [2, 256], strides = [1, 1]} : vector<16x256xf32> to vector<2x256xf32>
    %66 = vector.extract_strided_slice %49 {offsets = [10, 0], sizes = [2, 256], strides = [1, 1]} : vector<16x256xf32> to vector<2x256xf32>
    %67 = vector.shape_cast %11 : vector<1x256xi1> to vector<1x256xi1>
    %68 = vector.broadcast %67 : vector<1x256xi1> to vector<2x256xi1>
    %69 = arith.select %68, %65, %66 : vector<2x256xi1>, vector<2x256xf32>
    %70 = arith.addf %69, %52 : vector<2x256xf32>
    %71 = vector.extract_strided_slice %49 {offsets = [6, 0], sizes = [2, 256], strides = [1, 1]} : vector<16x256xf32> to vector<2x256xf32>
    %72 = vector.extract_strided_slice %49 {offsets = [8, 0], sizes = [2, 256], strides = [1, 1]} : vector<16x256xf32> to vector<2x256xf32>
    %73 = vector.shape_cast %11 : vector<1x256xi1> to vector<1x256xi1>
    %74 = vector.broadcast %73 : vector<1x256xi1> to vector<2x256xi1>
    %75 = arith.select %74, %71, %72 : vector<2x256xi1>, vector<2x256xf32>
    %76 = arith.addf %75, %52 : vector<2x256xf32>
    %77 = vector.extract_strided_slice %49 {offsets = [8, 0], sizes = [2, 256], strides = [1, 1]} : vector<16x256xf32> to vector<2x256xf32>
    %78 = vector.extract_strided_slice %49 {offsets = [6, 0], sizes = [2, 256], strides = [1, 1]} : vector<16x256xf32> to vector<2x256xf32>
    %79 = vector.shape_cast %11 : vector<1x256xi1> to vector<1x256xi1>
    %80 = vector.broadcast %79 : vector<1x256xi1> to vector<2x256xi1>
    %81 = arith.select %80, %77, %78 : vector<2x256xi1>, vector<2x256xf32>
    %82 = arith.addf %81, %52 : vector<2x256xf32>
    %83 = vector.extract_strided_slice %49 {offsets = [10, 0], sizes = [2, 256], strides = [1, 1]} : vector<16x256xf32> to vector<2x256xf32>
    %84 = vector.extract_strided_slice %49 {offsets = [4, 0], sizes = [2, 256], strides = [1, 1]} : vector<16x256xf32> to vector<2x256xf32>
    %85 = vector.shape_cast %11 : vector<1x256xi1> to vector<1x256xi1>
    %86 = vector.broadcast %85 : vector<1x256xi1> to vector<2x256xi1>
    %87 = arith.select %86, %83, %84 : vector<2x256xi1>, vector<2x256xf32>
    %88 = arith.addf %87, %52 : vector<2x256xf32>
    %89 = vector.extract_strided_slice %49 {offsets = [12, 0], sizes = [2, 256], strides = [1, 1]} : vector<16x256xf32> to vector<2x256xf32>
    %90 = vector.extract_strided_slice %49 {offsets = [2, 0], sizes = [2, 256], strides = [1, 1]} : vector<16x256xf32> to vector<2x256xf32>
    %91 = vector.shape_cast %11 : vector<1x256xi1> to vector<1x256xi1>
    %92 = vector.broadcast %91 : vector<1x256xi1> to vector<2x256xi1>
    %93 = arith.select %92, %89, %90 : vector<2x256xi1>, vector<2x256xf32>
    %94 = arith.addf %93, %52 : vector<2x256xf32>
    %95 = vector.extract_strided_slice %49 {offsets = [14, 0], sizes = [2, 256], strides = [1, 1]} : vector<16x256xf32> to vector<2x256xf32>
    %96 = vector.extract_strided_slice %49 {offsets = [0, 0], sizes = [2, 256], strides = [1, 1]} : vector<16x256xf32> to vector<2x256xf32>
    %97 = vector.shape_cast %11 : vector<1x256xi1> to vector<1x256xi1>
    %98 = vector.broadcast %97 : vector<1x256xi1> to vector<2x256xi1>
    %99 = arith.select %98, %95, %96 : vector<2x256xi1>, vector<2x256xf32>
    %100 = arith.addf %99, %52 : vector<2x256xf32>
    %cst_26 = arith.constant 0.000000e+00 : f32
    %101 = vector.broadcast %cst_26 : f32 to vector<2x64xf32>
    %102 = arith.negf %58 : vector<2x256xf32>
    %103 = math.exp %102 : vector<2x256xf32>
    %cst_27 = arith.constant 1.000000e+00 : f32
    %104 = vector.broadcast %cst_27 : f32 to vector<2x256xf32>
    %105 = arith.addf %104, %103 : vector<2x256xf32>
    %106 = arith.divf %104, %105 : vector<2x256xf32>
    %107 = vector.extract_strided_slice %106 {offsets = [0, 0], sizes = [2, 64], strides = [1, 1]} : vector<2x256xf32> to vector<2x64xf32>
    %108 = vector.extract_strided_slice %106 {offsets = [0, 64], sizes = [2, 64], strides = [1, 1]} : vector<2x256xf32> to vector<2x64xf32>
    %109 = vector.extract_strided_slice %106 {offsets = [0, 128], sizes = [2, 64], strides = [1, 1]} : vector<2x256xf32> to vector<2x64xf32>
    %cst_28 = arith.constant 2.000000e+00 : f32
    %110 = vector.broadcast %cst_28 : f32 to vector<2x64xf32>
    %111 = arith.mulf %110, %109 : vector<2x64xf32>
    %cst_29 = arith.constant 1.000000e+00 : f32
    %112 = vector.broadcast %cst_29 : f32 to vector<2x64xf32>
    %113 = arith.subf %111, %112 : vector<2x64xf32>
    %114 = vector.extract_strided_slice %106 {offsets = [0, 192], sizes = [2, 64], strides = [1, 1]} : vector<2x256xf32> to vector<2x64xf32>
    %115 = arith.mulf %108, %101 : vector<2x64xf32>
    %116 = arith.mulf %107, %113 : vector<2x64xf32>
    %117 = arith.addf %115, %116 : vector<2x64xf32>
    %118 = math.tanh %117 : vector<2x64xf32>
    %119 = arith.mulf %114, %118 : vector<2x64xf32>
    %cst_30 = arith.constant dense<0.000000e+00> : vector<2x256xf32>
    %120 = tpu.matmul %119, %6, %cst_30 {dimension_numbers = #tpu.dot_dimension_numbers<[1], [0], [0], [1], [0, 0, 1, 1], [], []>} : vector<2x64xf32>, vector<64x256xf32>, vector<2x256xf32> -> vector<2x256xf32>
    %121 = arith.addf %64, %120 : vector<2x256xf32>
    %122 = arith.negf %121 : vector<2x256xf32>
    %123 = math.exp %122 : vector<2x256xf32>
    %cst_31 = arith.constant 1.000000e+00 : f32
    %124 = vector.broadcast %cst_31 : f32 to vector<2x256xf32>
    %125 = arith.addf %124, %123 : vector<2x256xf32>
    %126 = arith.divf %124, %125 : vector<2x256xf32>
    %127 = vector.extract_strided_slice %126 {offsets = [0, 0], sizes = [2, 64], strides = [1, 1]} : vector<2x256xf32> to vector<2x64xf32>
    %128 = vector.extract_strided_slice %126 {offsets = [0, 64], sizes = [2, 64], strides = [1, 1]} : vector<2x256xf32> to vector<2x64xf32>
    %129 = vector.extract_strided_slice %126 {offsets = [0, 128], sizes = [2, 64], strides = [1, 1]} : vector<2x256xf32> to vector<2x64xf32>
    %cst_32 = arith.constant 2.000000e+00 : f32
    %130 = vector.broadcast %cst_32 : f32 to vector<2x64xf32>
    %131 = arith.mulf %130, %129 : vector<2x64xf32>
    %cst_33 = arith.constant 1.000000e+00 : f32
    %132 = vector.broadcast %cst_33 : f32 to vector<2x64xf32>
    %133 = arith.subf %131, %132 : vector<2x64xf32>
    %134 = vector.extract_strided_slice %126 {offsets = [0, 192], sizes = [2, 64], strides = [1, 1]} : vector<2x256xf32> to vector<2x64xf32>
    %135 = arith.mulf %128, %117 : vector<2x64xf32>
    %136 = arith.mulf %127, %133 : vector<2x64xf32>
    %137 = arith.addf %135, %136 : vector<2x64xf32>
    %138 = math.tanh %137 : vector<2x64xf32>
    %139 = arith.mulf %134, %138 : vector<2x64xf32>
    %cst_34 = arith.constant dense<0.000000e+00> : vector<2x256xf32>
    %140 = tpu.matmul %139, %6, %cst_34 {dimension_numbers = #tpu.dot_dimension_numbers<[1], [0], [0], [1], [0, 0, 1, 1], [], []>} : vector<2x64xf32>, vector<64x256xf32>, vector<2x256xf32> -> vector<2x256xf32>
    %141 = arith.addf %70, %140 : vector<2x256xf32>
    %142 = arith.negf %141 : vector<2x256xf32>
    %143 = math.exp %142 : vector<2x256xf32>
    %cst_35 = arith.constant 1.000000e+00 : f32
    %144 = vector.broadcast %cst_35 : f32 to vector<2x256xf32>
    %145 = arith.addf %144, %143 : vector<2x256xf32>
    %146 = arith.divf %144, %145 : vector<2x256xf32>
    %147 = vector.extract_strided_slice %146 {offsets = [0, 0], sizes = [2, 64], strides = [1, 1]} : vector<2x256xf32> to vector<2x64xf32>
    %148 = vector.extract_strided_slice %146 {offsets = [0, 64], sizes = [2, 64], strides = [1, 1]} : vector<2x256xf32> to vector<2x64xf32>
    %149 = vector.extract_strided_slice %146 {offsets = [0, 128], sizes = [2, 64], strides = [1, 1]} : vector<2x256xf32> to vector<2x64xf32>
    %cst_36 = arith.constant 2.000000e+00 : f32
    %150 = vector.broadcast %cst_36 : f32 to vector<2x64xf32>
    %151 = arith.mulf %150, %149 : vector<2x64xf32>
    %cst_37 = arith.constant 1.000000e+00 : f32
    %152 = vector.broadcast %cst_37 : f32 to vector<2x64xf32>
    %153 = arith.subf %151, %152 : vector<2x64xf32>
    %154 = vector.extract_strided_slice %146 {offsets = [0, 192], sizes = [2, 64], strides = [1, 1]} : vector<2x256xf32> to vector<2x64xf32>
    %155 = arith.mulf %148, %137 : vector<2x64xf32>
    %156 = arith.mulf %147, %153 : vector<2x64xf32>
    %157 = arith.addf %155, %156 : vector<2x64xf32>
    %158 = math.tanh %157 : vector<2x64xf32>
    %159 = arith.mulf %154, %158 : vector<2x64xf32>
    %cst_38 = arith.constant dense<0.000000e+00> : vector<2x256xf32>
    %160 = tpu.matmul %159, %6, %cst_38 {dimension_numbers = #tpu.dot_dimension_numbers<[1], [0], [0], [1], [0, 0, 1, 1], [], []>} : vector<2x64xf32>, vector<64x256xf32>, vector<2x256xf32> -> vector<2x256xf32>
    %161 = arith.addf %76, %160 : vector<2x256xf32>
    %162 = arith.negf %161 : vector<2x256xf32>
    %163 = math.exp %162 : vector<2x256xf32>
    %cst_39 = arith.constant 1.000000e+00 : f32
    %164 = vector.broadcast %cst_39 : f32 to vector<2x256xf32>
    %165 = arith.addf %164, %163 : vector<2x256xf32>
    %166 = arith.divf %164, %165 : vector<2x256xf32>
    %167 = vector.extract_strided_slice %166 {offsets = [0, 0], sizes = [2, 64], strides = [1, 1]} : vector<2x256xf32> to vector<2x64xf32>
    %168 = vector.extract_strided_slice %166 {offsets = [0, 64], sizes = [2, 64], strides = [1, 1]} : vector<2x256xf32> to vector<2x64xf32>
    %169 = vector.extract_strided_slice %166 {offsets = [0, 128], sizes = [2, 64], strides = [1, 1]} : vector<2x256xf32> to vector<2x64xf32>
    %cst_40 = arith.constant 2.000000e+00 : f32
    %170 = vector.broadcast %cst_40 : f32 to vector<2x64xf32>
    %171 = arith.mulf %170, %169 : vector<2x64xf32>
    %cst_41 = arith.constant 1.000000e+00 : f32
    %172 = vector.broadcast %cst_41 : f32 to vector<2x64xf32>
    %173 = arith.subf %171, %172 : vector<2x64xf32>
    %174 = vector.extract_strided_slice %166 {offsets = [0, 192], sizes = [2, 64], strides = [1, 1]} : vector<2x256xf32> to vector<2x64xf32>
    %175 = arith.mulf %168, %157 : vector<2x64xf32>
    %176 = arith.mulf %167, %173 : vector<2x64xf32>
    %177 = arith.addf %175, %176 : vector<2x64xf32>
    %178 = math.tanh %177 : vector<2x64xf32>
    %179 = arith.mulf %174, %178 : vector<2x64xf32>
    %cst_42 = arith.constant dense<0.000000e+00> : vector<2x256xf32>
    %180 = tpu.matmul %179, %6, %cst_42 {dimension_numbers = #tpu.dot_dimension_numbers<[1], [0], [0], [1], [0, 0, 1, 1], [], []>} : vector<2x64xf32>, vector<64x256xf32>, vector<2x256xf32> -> vector<2x256xf32>
    %181 = arith.addf %82, %180 : vector<2x256xf32>
    %182 = arith.negf %181 : vector<2x256xf32>
    %183 = math.exp %182 : vector<2x256xf32>
    %cst_43 = arith.constant 1.000000e+00 : f32
    %184 = vector.broadcast %cst_43 : f32 to vector<2x256xf32>
    %185 = arith.addf %184, %183 : vector<2x256xf32>
    %186 = arith.divf %184, %185 : vector<2x256xf32>
    %187 = vector.extract_strided_slice %186 {offsets = [0, 0], sizes = [2, 64], strides = [1, 1]} : vector<2x256xf32> to vector<2x64xf32>
    %188 = vector.extract_strided_slice %186 {offsets = [0, 64], sizes = [2, 64], strides = [1, 1]} : vector<2x256xf32> to vector<2x64xf32>
    %189 = vector.extract_strided_slice %186 {offsets = [0, 128], sizes = [2, 64], strides = [1, 1]} : vector<2x256xf32> to vector<2x64xf32>
    %cst_44 = arith.constant 2.000000e+00 : f32
    %190 = vector.broadcast %cst_44 : f32 to vector<2x64xf32>
    %191 = arith.mulf %190, %189 : vector<2x64xf32>
    %cst_45 = arith.constant 1.000000e+00 : f32
    %192 = vector.broadcast %cst_45 : f32 to vector<2x64xf32>
    %193 = arith.subf %191, %192 : vector<2x64xf32>
    %194 = vector.extract_strided_slice %186 {offsets = [0, 192], sizes = [2, 64], strides = [1, 1]} : vector<2x256xf32> to vector<2x64xf32>
    %195 = arith.mulf %188, %177 : vector<2x64xf32>
    %196 = arith.mulf %187, %193 : vector<2x64xf32>
    %197 = arith.addf %195, %196 : vector<2x64xf32>
    %198 = math.tanh %197 : vector<2x64xf32>
    %199 = arith.mulf %194, %198 : vector<2x64xf32>
    %cst_46 = arith.constant dense<0.000000e+00> : vector<2x256xf32>
    %200 = tpu.matmul %199, %6, %cst_46 {dimension_numbers = #tpu.dot_dimension_numbers<[1], [0], [0], [1], [0, 0, 1, 1], [], []>} : vector<2x64xf32>, vector<64x256xf32>, vector<2x256xf32> -> vector<2x256xf32>
    %201 = arith.addf %88, %200 : vector<2x256xf32>
    %202 = arith.negf %201 : vector<2x256xf32>
    %203 = math.exp %202 : vector<2x256xf32>
    %cst_47 = arith.constant 1.000000e+00 : f32
    %204 = vector.broadcast %cst_47 : f32 to vector<2x256xf32>
    %205 = arith.addf %204, %203 : vector<2x256xf32>
    %206 = arith.divf %204, %205 : vector<2x256xf32>
    %207 = vector.extract_strided_slice %206 {offsets = [0, 0], sizes = [2, 64], strides = [1, 1]} : vector<2x256xf32> to vector<2x64xf32>
    %208 = vector.extract_strided_slice %206 {offsets = [0, 64], sizes = [2, 64], strides = [1, 1]} : vector<2x256xf32> to vector<2x64xf32>
    %209 = vector.extract_strided_slice %206 {offsets = [0, 128], sizes = [2, 64], strides = [1, 1]} : vector<2x256xf32> to vector<2x64xf32>
    %cst_48 = arith.constant 2.000000e+00 : f32
    %210 = vector.broadcast %cst_48 : f32 to vector<2x64xf32>
    %211 = arith.mulf %210, %209 : vector<2x64xf32>
    %cst_49 = arith.constant 1.000000e+00 : f32
    %212 = vector.broadcast %cst_49 : f32 to vector<2x64xf32>
    %213 = arith.subf %211, %212 : vector<2x64xf32>
    %214 = vector.extract_strided_slice %206 {offsets = [0, 192], sizes = [2, 64], strides = [1, 1]} : vector<2x256xf32> to vector<2x64xf32>
    %215 = arith.mulf %208, %197 : vector<2x64xf32>
    %216 = arith.mulf %207, %213 : vector<2x64xf32>
    %217 = arith.addf %215, %216 : vector<2x64xf32>
    %218 = math.tanh %217 : vector<2x64xf32>
    %219 = arith.mulf %214, %218 : vector<2x64xf32>
    %cst_50 = arith.constant dense<0.000000e+00> : vector<2x256xf32>
    %220 = tpu.matmul %219, %6, %cst_50 {dimension_numbers = #tpu.dot_dimension_numbers<[1], [0], [0], [1], [0, 0, 1, 1], [], []>} : vector<2x64xf32>, vector<64x256xf32>, vector<2x256xf32> -> vector<2x256xf32>
    %221 = arith.addf %94, %220 : vector<2x256xf32>
    %222 = arith.negf %221 : vector<2x256xf32>
    %223 = math.exp %222 : vector<2x256xf32>
    %cst_51 = arith.constant 1.000000e+00 : f32
    %224 = vector.broadcast %cst_51 : f32 to vector<2x256xf32>
    %225 = arith.addf %224, %223 : vector<2x256xf32>
    %226 = arith.divf %224, %225 : vector<2x256xf32>
    %227 = vector.extract_strided_slice %226 {offsets = [0, 0], sizes = [2, 64], strides = [1, 1]} : vector<2x256xf32> to vector<2x64xf32>
    %228 = vector.extract_strided_slice %226 {offsets = [0, 64], sizes = [2, 64], strides = [1, 1]} : vector<2x256xf32> to vector<2x64xf32>
    %229 = vector.extract_strided_slice %226 {offsets = [0, 128], sizes = [2, 64], strides = [1, 1]} : vector<2x256xf32> to vector<2x64xf32>
    %cst_52 = arith.constant 2.000000e+00 : f32
    %230 = vector.broadcast %cst_52 : f32 to vector<2x64xf32>
    %231 = arith.mulf %230, %229 : vector<2x64xf32>
    %cst_53 = arith.constant 1.000000e+00 : f32
    %232 = vector.broadcast %cst_53 : f32 to vector<2x64xf32>
    %233 = arith.subf %231, %232 : vector<2x64xf32>
    %234 = vector.extract_strided_slice %226 {offsets = [0, 192], sizes = [2, 64], strides = [1, 1]} : vector<2x256xf32> to vector<2x64xf32>
    %235 = arith.mulf %228, %217 : vector<2x64xf32>
    %236 = arith.mulf %227, %233 : vector<2x64xf32>
    %237 = arith.addf %235, %236 : vector<2x64xf32>
    %238 = math.tanh %237 : vector<2x64xf32>
    %239 = arith.mulf %234, %238 : vector<2x64xf32>
    %cst_54 = arith.constant dense<0.000000e+00> : vector<2x256xf32>
    %240 = tpu.matmul %239, %6, %cst_54 {dimension_numbers = #tpu.dot_dimension_numbers<[1], [0], [0], [1], [0, 0, 1, 1], [], []>} : vector<2x64xf32>, vector<64x256xf32>, vector<2x256xf32> -> vector<2x256xf32>
    %241 = arith.addf %100, %240 : vector<2x256xf32>
    %242 = arith.negf %241 : vector<2x256xf32>
    %243 = math.exp %242 : vector<2x256xf32>
    %cst_55 = arith.constant 1.000000e+00 : f32
    %244 = vector.broadcast %cst_55 : f32 to vector<2x256xf32>
    %245 = arith.addf %244, %243 : vector<2x256xf32>
    %246 = arith.divf %244, %245 : vector<2x256xf32>
    %247 = vector.extract_strided_slice %246 {offsets = [0, 0], sizes = [2, 64], strides = [1, 1]} : vector<2x256xf32> to vector<2x64xf32>
    %248 = vector.extract_strided_slice %246 {offsets = [0, 64], sizes = [2, 64], strides = [1, 1]} : vector<2x256xf32> to vector<2x64xf32>
    %249 = vector.extract_strided_slice %246 {offsets = [0, 128], sizes = [2, 64], strides = [1, 1]} : vector<2x256xf32> to vector<2x64xf32>
    %cst_56 = arith.constant 2.000000e+00 : f32
    %250 = vector.broadcast %cst_56 : f32 to vector<2x64xf32>
    %251 = arith.mulf %250, %249 : vector<2x64xf32>
    %cst_57 = arith.constant 1.000000e+00 : f32
    %252 = vector.broadcast %cst_57 : f32 to vector<2x64xf32>
    %253 = arith.subf %251, %252 : vector<2x64xf32>
    %254 = vector.extract_strided_slice %246 {offsets = [0, 192], sizes = [2, 64], strides = [1, 1]} : vector<2x256xf32> to vector<2x64xf32>
    %255 = arith.mulf %248, %237 : vector<2x64xf32>
    %256 = arith.mulf %247, %253 : vector<2x64xf32>
    %257 = arith.addf %255, %256 : vector<2x64xf32>
    %258 = math.tanh %257 : vector<2x64xf32>
    %259 = arith.mulf %254, %258 : vector<2x64xf32>
    %260 = tpu.concatenate %259, %257 in 1 : vector<2x64xf32>, vector<2x64xf32> -> vector<2x128xf32>
    %cst_58 = arith.constant dense<0.000000e+00> : vector<2x32xf32>
    %261 = tpu.matmul %260, %15, %cst_58 {dimension_numbers = #tpu.dot_dimension_numbers<[1], [0], [0], [1], [0, 0, 1, 1], [], []>} : vector<2x128xf32>, vector<128x32xf32>, vector<2x32xf32> -> vector<2x32xf32>
    %262 = vector.broadcast %16 : vector<1x32xf32> to vector<2x32xf32>
    %263 = arith.addf %261, %262 : vector<2x32xf32>
    %cst_59 = arith.constant dense<0.000000e+00> : vector<2x2xf32>
    %264 = tpu.matmul %263, %17, %cst_59 {dimension_numbers = #tpu.dot_dimension_numbers<[1], [0], [0], [1], [0, 0, 1, 1], [], []>} : vector<2x32xf32>, vector<32x2xf32>, vector<2x2xf32> -> vector<2x2xf32>
    %265 = vector.broadcast %18 : vector<1x2xf32> to vector<2x2xf32>
    %266 = arith.addf %264, %265 : vector<2x2xf32>
    %c0_60 = arith.constant 0 : index
    %c0_61 = arith.constant 0 : index
    %267 = vector.load %arg3[%c0_60, %c0_61] : memref<2x2xf32, #tpu.memory_space<vmem>>, vector<2x2xf32>
    tpu.vector_store %arg3[%c0_60, %c0_61], %266 {strides = array<i32>} : memref<2x2xf32, #tpu.memory_space<vmem>>, vector<2x2xf32>,
    return
  }
}

</mosaic_0001>

<bundles_post_ra>
// kernel: drqa_forward.1
= control target key start
LH: loop header
LB: loop body
LE: loop exit
PB: predicated region body
PF: predicated region fallthrough
CT: control target
= control target key end

     0   :  { %8 = vsyncpa [#allocation3], 0  ;;  %s2493_s0 = inlined_call_operand.vmem [shape: s32[16,2], index: 0, kind: input, shape index: {}]   ;;  %s2494_s1 = inlined_call_operand.hbm [shape: f32[195,256], index: 1, kind: input, shape index: {}]   ;;  %s2495_s2 = inlined_call_operand.vmem [shape: f32[256,32], index: 2, kind: input, shape index: {}]   ;;  %s2496_s3 = inlined_call_operand.hbm [shape: f32[2,2], index: 3, kind: output, shape index: {}]  }
   0x1   :  { %9 = vsyncpa [#allocation4], 0  ;;  %s2012_s12 = smov [#allocation2]  }
   0x2   :  { %s17_s13 = sshll.u32 %s2012_s12, 4  ;;  %s18_s13 = int_to_ptr.vmem [resolvable:$true] %s17_s13 }
   0x3   :  { %s1976_s14 = scalar_lea.vmem %s18_s13, 6400  ;;  %p1981_p1 = scmp.lt.s32.totalorder %s18_s13, %s18_s13 }
   0x4   :  { %p1977_p0 = scmp.ne.s32.totalorder %s18_s13, %s1976_s14  ;;  %p1982_p2 = scmp.lt.s32.totalorder %s1976_s14, %s1976_s14 }
   0x6   :  { %p1983_p3 = por %p1982_p2, %p1981_p1 }
   0x8   :  { %p1984_p4 = pnand %p1983_p3, %p1977_p0 }
   0xa   :  { %1987 = shalt.err (!%p1984_p4)
}
   0xb   :  { %s2013_s15 = smov 256   ;;  %s2014_s16 = smov 16  }
   0xc   :  { %23 = dma.hbm_to_vmem [thread:$0]  %s2494_s1, 6400, %s18_s13, [#allocation3], %s2013_s15, %s2013_s15, %s2014_s16  }
   0xd   :  { %2008 = dma.done.wait [#allocation3], 6400  }
   0xe   :  { %2009 = vsyncadd [#allocation3], 4294960896  ;;  %v2015_v0 = vmov 1   ;;  %v2016_v1 = vmov 0.0   ;;  %v2050_v2 = vld [vmem:[%s2493_s0 + $0x8] sm:$0xff]  ;;  %v2056_v3 = vld [vmem:[%s2493_s0] sm:$0xff]  ;;  %v118_v5 = vlaneseq }
   0xf   :  { %1881 = vset.pattern.permute.xlu0 %v2015_v0  ;;  %1793 = vmatprep.subr.mxu1 %v2016_v1  ;;  %vm2017_vm0 = vmmov 0   ;;  %vm144_vm1 = vcmask 130048   ;;  %v93_v4 = vld [vmem:[%s2495_s2 + $0x38] sm:$0xff]  ;;  %v2018_v8 = vmov 1.0   ;;  %v95_v10 = vld [vmem:[%s2495_s2 + $0x48] sm:$0x3] }
  0x10   :  { %136 = vperm.xlu0 %1881, %v2050_v2   ;;  %1797 = vmatprep.mubr.msk.f32.mxu1 %vm2017_vm0, %v2016_v1  ;;  %v2066_v6 = vand.u32 127, %v118_v5  ;;  %v58_v11 = vld [vmem:[#allocation2 + $0xd8] sm:$0xff]  ;;  %v94_v12 = vld [vmem:[%s2495_s2 + $0x40] sm:$0xff]  ;;  %v57_v13 = vld [vmem:[#allocation2 + $0xd0] sm:$0xff]  ;;  %vm218_vm4 = vcmask 457728   ;;  %v2019_v35 = vmov 16  }
  0x11   :  { %1821 = vmatprep.mubr.msk.f32.mxu0 %vm144_vm1, %v93_v4  ;;  %v56_v14 = vld [vmem:[#allocation2 + $0xc8] sm:$0xff]  ;;  %v55_v15 = vld [vmem:[#allocation2 + $0xc0] sm:$0xff]  ;;  %v92_v16 = vld [vmem:[%s2495_s2 + $0x30] sm:$0xff]  ;;  %1882 = vset.pattern.permute.xlu1 %v2019_v35  ;;  %v2020_v38 = vmov 0   ;;  %s2021_s14 = smov 64   ;;  %vm759_vm12 = vcmask 523264  }
  0x12   :  { %v54_v17 = vld [vmem:[#allocation2 + $0xb8] sm:$0xff]  ;;  %v53_v18 = vld [vmem:[#allocation2 + $0xb0] sm:$0xff]  ;;  %v91_v19 = vld [vmem:[%s2495_s2 + $0x28] sm:$0xff]  ;;  %vm1612_vm13 = vcmask 261120   ;;  %s2022_s28 = smov [#allocation5]   ;;  %vm1686_vm14 = vcmask 9216  }
  0x13   :  { %v52_v20 = vld [vmem:[#allocation2 + $0xa8] sm:$0xff]  ;;  %v51_v21 = vld [vmem:[#allocation2 + $0xa0] sm:$0xff]  ;;  %v50_v23 = vld [vmem:[#allocation2 + $0x98] sm:$0xff]  ;;  %s1694_s29 = sshll.u32 %s2022_s28, 4  ;;  %s1695_s29 = int_to_ptr.vmem [resolvable:$true] %s1694_s29 }
  0x14   :  { %133 = vperm.xlu0 %1881, %v2056_v3   ;;  %v90_v22 = vld [vmem:[%s2495_s2 + $0x20] sm:$0xff]  ;;  %v49_v24 = vld [vmem:[#allocation2 + $0x90] sm:$0xff]  ;;  %v89_v25 = vld [vmem:[%s2495_s2 + $0x18] sm:$0xff]  ;;  %s1988_s30 = scalar_lea.vmem %s1695_s29, 32  ;;  %p1993_p6 = scmp.lt.s32.totalorder %s1695_s29, %s1695_s29 }
  0x15   :  { %v48_v26 = vld [vmem:[#allocation2 + $0x88] sm:$0xff]  ;;  %v47_v27 = vld [vmem:[#allocation2 + $0x80] sm:$0xff]  ;;  %v88_v28 = vld [vmem:[%s2495_s2 + $0x10] sm:$0xff]  ;;  %p1989_p5 = scmp.ne.s32.totalorder %s1695_s29, %s1988_s30  ;;  %p1994_p7 = scmp.lt.s32.totalorder %s1988_s30, %s1988_s30 }
  0x16   :  { %v46_v29 = vld [vmem:[#allocation2 + $0x78] sm:$0xff]  ;;  %v45_v30 = vld [vmem:[#allocation2 + $0x70] sm:$0xff]  ;;  %v87_v31 = vld [vmem:[%s2495_s2 + $0x8] sm:$0xff] }
  0x17   :  { %v86_v34 = vld [vmem:[%s2495_s2] sm:$0xff]  ;;  %v44_v39 = vld [vmem:[#allocation2 + $0x68] sm:$0xff]  ;;  %v42_v41 = vld [vmem:[#allocation2 + $0x58] sm:$0xff]  ;;  %p1995_p8 = por %p1994_p7, %p1993_p6 }
  0x18   :  { %1884 = vset.pattern.permute.xlu0 %v2020_v38  ;;  %v43_v40 = vld [vmem:[#allocation2 + $0x60] sm:$0xff]  ;;  %v41_v42 = vld [vmem:[#allocation2 + $0x50] sm:$0xff]  ;;  %v40_v43 = vld [vmem:[#allocation2 + $0x48] sm:$0xff] }
  0x19   :  { %124 = vperm.xlu0 %1884, %v2050_v2   ;;  %v39_v44 = vld [vmem:[#allocation2 + $0x40] sm:$0xff]  ;;  %v38_v45 = vld [vmem:[#allocation2 + $0x38] sm:$0xff]  ;;  %v37_v46 = vld [vmem:[#allocation2 + $0x30] sm:$0xff]  ;;  %p1996_p9 = pnand %p1995_p8, %p1989_p5 }
  0x1a   :  { %v36_v47 = vld [vmem:[#allocation2 + $0x28] sm:$0xff]  ;;  %v35_v48 = vld [vmem:[#allocation2 + $0x20] sm:$0xff]  ;;  %v34_v49 = vld [vmem:[#allocation2 + $0x18] sm:$0xff] }
  0x1b   :  { %v33_v51 = vld [vmem:[#allocation2 + $0x10] sm:$0xff]  ;;  %v32_v52 = vld [vmem:[#allocation2 + $0x8] sm:$0xff]  ;;  %v31_v54 = vld [vmem:[#allocation2] sm:$0xff] }
  0x1c   :  { %v62_v55 = vld [vmem:[#allocation2 + $0xf8] sm:$0xff]  ;;  %v61_v56 = vld [vmem:[#allocation2 + $0xf0] sm:$0xff]  ;;  %v60_v57 = vld [vmem:[#allocation2 + $0xe8] sm:$0xff] }
  0x1d   :  { %1885 = vset.pattern.permute.xlu0 %v2019_v35  ;;  %v59_v58 = vld [vmem:[#allocation2 + $0xe0] sm:$0xff] }
  0x8b   :  { %v2068_v7 = vpop.permute.xlu0 %136 }
  0x8c   :  { %vm139_vm2 = vcmp.eq.s32.totalorder %v2068_v7, %v2066_v6 }
  0x8d   :  { %1794 = vmatpush3.msk.msra.mxu1 %vm139_vm2, %v2018_v8  ;;  %1817 = vmatprep.subr.msk.mxu0 %vm139_vm2, %v2018_v8  ;;  %v1706_v33 = vsel %vm139_vm2, 1.0, %v2016_v1 }
  0x8e   :  { %1818 = vmatpush3.msk.msra.mxu0 %vm139_vm2, %v2018_v8  ;;  %1795 = vmatprep.subr.mxu1 %v2016_v1 }
  0x8f   :  { %v134_v9 = vpop.permute.xlu0 %133 }
  0x90   :  { %vm138_vm3 = vcmp.eq.s32.totalorder %v134_v9, %v2066_v6 }
  0x91   :  { %1796 = vmatpush3.msk.msra.mxu1 %vm138_vm3, %v2018_v8  ;;  %1819 = vmatprep.subr.msk.mxu0 %vm138_vm3, %v2018_v8  ;;  %v1705_v32 = vsel %vm138_vm3, 1.0, %v2016_v1 }
  0x92   :  { %1798 = vmatmul.mubr.msk.f32.vlgmr.msra.gmra.mxu1 %vm144_vm1, %v95_v10  ;;  %1820 = vmatpush3.msk.msra.mxu0 %vm138_vm3, %v2018_v8 }
  0x93   :  { %418 = vmatprep.subr.mxu0 %v58_v11  ;;  %1822 = vmatmul.mubr.msk.f32.vlgmr.msra.gmra.mxu0 %vm144_vm1, %v94_v12  ;;  %v84_v12 = vld [vmem:[#allocation2 + $0x182] ss:$8 sm:$0x3] }
  0x94   :  { %419 = vmatpush1.msra.mxu0 %v57_v13  ;;  %464 = vmatprep.mubr.f32.mxu0 %v2016_v1  ;;  %v125_v59 = vpop.permute.xlu0 %124  ;;  %vm85_vm8 = vcmp.gt.f32.partialorder %v84_v12, 0.5 }
  0x95   :  { %420 = vmatprep.subr.mxu0 %v56_v14  ;;  %1800 = vmatprep.subr.mxu1 %v2016_v1  ;;  %vm127_vm5 = vcmp.eq.s32.totalorder %v125_v59, %v2066_v6 }
  0x96   :  { %421 = vmatpush1.msra.mxu0 %v55_v15  ;;  %1801 = vmatpush3.msra.mxu1 %v92_v16  ;;  %v1704_v60 = vsel %vm127_vm5, 1.0, %v2016_v1  ;;  %v80_v15 = vld [vmem:[#allocation2 + $0x180] ss:$8 sm:$0x3] }
  0x97   :  { %422 = vmatprep.subr.mxu0 %v54_v17  ;;  %1802 = vmatprep.subr.mxu1 %v2016_v1 }
  0x98   :  { %423 = vmatpush1.msra.mxu0 %v53_v18  ;;  %1803 = vmatpush3.msra.mxu1 %v91_v19 }
  0x99   :  { %424 = vmatprep.subr.mxu0 %v52_v20  ;;  %1804 = vmatprep.subr.mxu1 %v2016_v1 }
  0x9a   :  { %425 = vmatpush1.msra.mxu0 %v51_v21  ;;  %1805 = vmatpush3.msra.mxu1 %v90_v22  ;;  %v664_v21 = vsel %vm85_vm8, 1, %v2020_v38 }
  0x9b   :  { %426 = vmatprep.subr.mxu0 %v50_v23  ;;  %1806 = vmatprep.subr.mxu1 %v2016_v1 }
  0x9c   :  { %427 = vmatpush1.msra.mxu0 %v49_v24  ;;  %1807 = vmatpush3.msra.mxu1 %v89_v25 }
  0x9d   :  { %428 = vmatprep.subr.mxu0 %v48_v26  ;;  %1808 = vmatprep.subr.mxu1 %v2016_v1 }
  0x9e   :  { %429 = vmatpush1.msra.mxu0 %v47_v27  ;;  %1809 = vmatpush3.msra.mxu1 %v88_v28 }
  0x9f   :  { %430 = vmatprep.subr.mxu0 %v46_v29  ;;  %1810 = vmatprep.subr.mxu1 %v2016_v1 }
  0xa0   :  { %431 = vmatpush1.msra.mxu0 %v45_v30  ;;  %1811 = vmatpush3.msra.mxu1 %v87_v31  ;;  %v82_v31 = vld [vmem:[#allocation2 + $0x181] ss:$8 sm:$0x3] }
  0xa1   :  { %1717 = vmatmul.mubr.msk.f32.vlgmr.msra.gmra.mxu0 %vm218_vm4, %v1705_v32  ;;  %1812 = vmatprep.subr.mxu1 %v2016_v1 }
  0xa2   :  { %470 = vmatprep.mubr.f32.mxu0 %v2016_v1  ;;  %1814 = vmatprep.mubr.msk.f32.mxu1 %vm2017_vm0, %v2016_v1 }
  0xa3   :  { %1813 = vmatpush3.msra.mxu1 %v86_v34  ;;  %621 = vmatprep.subr.mxu0 %v62_v55 }
  0xa4   :  { %501 = vmatprep.subr.mxu1 %v44_v39  ;;  %622 = vmatpush1.msra.mxu0 %v61_v56 }
  0xa5   :  { %1718 = vmatmul.mubr.msk.f32.gmra.mxu0 %vm218_vm4, %v1706_v33  ;;  %623 = vmatprep.subr.mxu0 %v60_v57 }
  0xa6   :  { %657 = vmatprep.mubr.f32.mxu0 %v2016_v1  ;;  %624 = vmatpush1.msra.mxu0 %v59_v58 }
 0x152   :  { %v214_v36 = vpop.f32.mrf.mxu1 }
 0x153   :  { %1815 = vmatmul.mubr.msk.f32.vlgmr.msra.gmra.mxu1 %vm218_vm4, %v214_v36  ;;  %v1823_v61 = vpop.f32.mrf.mxu0 }
 0x154   :  { %v1799_v37 = vpop.f32.mrf.mxu1  ;;  %547 = vmatprep.mubr.f32.mxu1 %v2016_v1  ;;  %502 = vmatpush1.msra.mxu1 %v43_v40  ;;  %v381_v62 = vmul.f32 %v1823_v61, %v1704_v60 }
 0x155   :  { %503 = vmatprep.subr.mxu1 %v42_v41 }
 0x156   :  { %504 = vmatpush1.msra.mxu1 %v41_v42  ;;  %v385_v63 = vsel %vm218_vm4, %v381_v62, 0.0 }
 0x157   :  { %505 = vmatprep.subr.mxu1 %v40_v43 }
 0x158   :  { %506 = vmatpush1.msra.mxu1 %v39_v44 }
 0x159   :  { %507 = vmatprep.subr.mxu1 %v38_v45 }
 0x15a   :  { %508 = vmatpush1.msra.mxu1 %v37_v46  ;;  %v2241_v46 = vld [vmem:[#allocation2 + $0x138] sm:$0xff] }
 0x15b   :  { %509 = vmatprep.subr.mxu1 %v36_v47 }
 0x15c   :  { %510 = vmatpush1.msra.mxu1 %v35_v48 }
 0x15d   :  { %511 = vmatprep.subr.mxu1 %v34_v49 }
 0x15e   :  { %512 = vmatpush1.msra.mxu1 %v33_v51 }
 0x15f   :  { %513 = vmatprep.subr.mxu1 %v32_v52 }
 0x160   :  { %514 = vmatpush1.msra.mxu1 %v31_v54 }
 0x213   :  { %v288_v50 = vpop.f32.mrf.mxu1 }
 0x214   :  { %294 = vperm.xlu1 %1882, %v288_v50  }
 0x215   :  { %v1816_v53 = vpop.f32.mrf.mxu1 }
 0x218   :  { %1883 = vset.pattern.permute.xlu1 %v2020_v38  ;;  %v2214_v38 = vld [vmem:[#allocation2 + $0x178] sm:$0xff] }
 0x219   :  { %121 = vperm.xlu1 %1883, %v2056_v3   ;;  %v371_v3 = vpop.f32.mrf.mxu0  ;;  %778 = vmatprep.subr.mxu1 %v2214_v38 }
 0x21a   :  { %889 = vmatprep.subr.mxu0 %v2214_v38 }
 0x21b   :  { %v466_v14 = vpop.f32.mrf.mxu0 }
 0x21d   :  { %v468_v19 = vpop.f32.mrf.mxu0 }
 0x21f   :  { %v472_v25 = vpop.f32.mrf.mxu0 }
 0x221   :  { %v474_v37 = vpop.f32.mrf.mxu0 }
 0x23d   :  { %386 = vadd.xlane.f32.xlu1 %v385_v63 }
 0x28f   :  { %v295_v0 = vpop.permute.xlu1 %294 }
 0x290   :  { %1886 = vrcp.f32 %v295_v0 }
 0x294   :  { %v122_v2 = vpop.permute.xlu1 %121 }
 0x295   :  { %vm126_vm6 = vcmp.eq.s32.totalorder %v122_v2, %v2066_v6  ;;  %v562_v6 = vshrl.u32 %v118_v5, 7 }
 0x296   :  { %v1703_v4 = vsel %vm126_vm6, 1.0, %v2016_v1 }
 0x297   :  { %1719 = vmatmul.mubr.msk.f32.vlgmr.msra.gmra.mxu1 %vm218_vm4, %v1703_v4  ;;  %v380_v7 = vmul.f32 %v1703_v4, %v371_v3  ;;  %v563_v13 = vsub.s32 0, %v562_v6  ;;  %v567_v16 = vsub.s32 1, %v562_v6 }
 0x298   :  { %553 = vmatprep.mubr.f32.mxu1 %v2016_v1 }
 0x299   :  { %v382_v8 = vsel %vm218_vm4, %v380_v7, 0.0  ;;  %v564_v18 = vrot.slane %v80_v15, %v563_v13  ;;  %v568_v22 = vrot.slane %v80_v15, %v567_v16  ;;  %v668_v26 = vrot.slane %v664_v21, %v563_v13 }
 0x29a   :  { %383 = vadd.xlane.f32.xlu0 %v382_v8  ;;  %v672_v32 = vrot.slane %v664_v21, %v567_v16  ;;  %v583_v41 = vrot.slane %v82_v31, %v563_v13  ;;  %v587_v47 = vrot.slane %v82_v31, %v567_v16 }
 0x29b   :  { %1720 = vmatmul.mubr.msk.f32.gmra.mxu1 %vm218_vm4, %v1704_v60  ;;  %vm2161_vm10 = vcmp.eq.s32.totalorder %v668_v26, 1 }
 0x29c   :  { %826 = vmatprep.mubr.f32.mxu1 %v2016_v1  ;;  %vm2165_vm11 = vcmp.eq.s32.totalorder %v672_v32, 1 }
 0x29d   :  { %v1887_v9 = vpop.eup %1886 }
 0x29e   :  { %v298_v10 = vmul.f32 %v1887_v9, %v288_v50 }
 0x2a0   :  { %1721 = vmatmul.mubr.msk.f32.vlgmr.msra.gmra.mxu0 %vm144_vm1, %v298_v10 }
 0x2a1   :  { %937 = vmatprep.mubr.f32.mxu0 %v2016_v1 }
 0x2c6   :  { %v387_v17 = vpop.xlane.xlu1 %386 }
 0x2c7   :  { %vm389_vm9 = vcmp.gt.f32.partialorder %v387_v17, 0.0 }
 0x2c8   :  { %v1716_v27 = vsel %vm389_vm9, 1.0, %v2016_v1 }
 0x2c9   :  { %v573_v35 = vmul.f32 %v1716_v27, %v564_v18  ;;  %v574_v42 = vmul.f32 %v1716_v27, %v568_v22 }
 0x323   :  { %v384_v11 = vpop.xlane.xlu0 %383 }
 0x324   :  { %vm388_vm7 = vcmp.gt.f32.partialorder %v384_v11, 0.0 }
 0x325   :  { %v1715_v20 = vsel %vm388_vm7, 1.0, %v2016_v1 }
 0x326   :  { %v571_v24 = vmul.f32 %v1715_v20, %v564_v18  ;;  %v572_v33 = vmul.f32 %v1715_v20, %v568_v22 }
 0x357   :  { %v549_v23 = vpop.f32.mrf.mxu1 }
 0x358   :  { %v550_v5 = vadd.f32 %v549_v23, %v466_v14 }
 0x359   :  { %v551_v28 = vpop.f32.mrf.mxu1 }
 0x35a   :  { %v575_v29 = vadd.f32 %v571_v24, %v550_v5  ;;  %v552_v30 = vadd.f32 %v551_v28, %v468_v19 }
 0x35b   :  { %v555_v34 = vpop.f32.mrf.mxu1 }
 0x35c   :  { %v556_v36 = vadd.f32 %v555_v34, %v472_v25  ;;  %v576_v39 = vadd.f32 %v572_v33, %v552_v30  ;;  %v713_v45 = vrot.slane %v575_v29, 6  ;;  %v721_v48 = vrot.slane %v575_v29, 2 }
 0x35d   :  { %v557_v40 = vpop.f32.mrf.mxu1 }
 0x35e   :  { %v577_v43 = vadd.f32 %v573_v35, %v556_v36  ;;  %v558_v44 = vadd.f32 %v557_v40, %v474_v37  ;;  %v714_v55 = vrot.slane %v576_v39, 6  ;;  %v722_v57 = vrot.slane %v576_v39, 2  ;;  %v2218_v40 = vld [vmem:[#allocation2 + $0x168] sm:$0xff] }
 0x360   :  { %v677_v49 = vrot.slane %v577_v43, 6  ;;  %v578_v50 = vadd.f32 %v574_v42, %v558_v44  ;;  %v659_v51 = vpop.f32.mrf.mxu0  ;;  %v685_v52 = vrot.slane %v577_v43, 2  ;;  %v717_v53 = vsel %vm2161_vm10, %v577_v43, %v713_v45  ;;  %v2225_v42 = vld [vmem:[#allocation2 + $0x158] sm:$0xff]  ;;  %v2233_v44 = vld [vmem:[#allocation2 + $0x148] sm:$0xff]  ;;  %v2237_v45 = vld [vmem:[#allocation2 + $0x140] sm:$0xff] }
 0x361   :  { %v660_v54 = vadd.f32 %v659_v51, %v583_v41  ;;  %v725_v56 = vsel %vm2161_vm10, %v577_v43, %v721_v48  ;;  %v2221_v41 = vld [vmem:[#allocation2 + $0x160] sm:$0xff]  ;;  %v2229_v43 = vld [vmem:[#allocation2 + $0x150] sm:$0xff]  ;;  %v2249_v48 = vld [vmem:[#allocation2 + $0x128] sm:$0xff] }
 0x362   :  { %v678_v58 = vrot.slane %v578_v50, 6  ;;  %v681_v59 = vsel %vm2161_vm10, %v575_v29, %v677_v49  ;;  %v661_v60 = vpop.f32.mrf.mxu0  ;;  %v689_v61 = vsel %vm2161_vm10, %v575_v29, %v685_v52  ;;  %v686_v62 = vrot.slane %v578_v50, 2  ;;  %v2253_v49 = vld [vmem:[#allocation2 + $0x120] sm:$0xff]  ;;  %v2261_v51 = vld [vmem:[#allocation2 + $0x110] sm:$0xff]  ;;  %v2265_v52 = vld [vmem:[#allocation2 + $0x108] sm:$0xff] }
 0x363   :  { %v683_v63 = vadd.f32 %v681_v59, %v660_v54  ;;  %v662_v0 = vadd.f32 %v661_v60, %v587_v47  ;;  %v693_v2 = vrot.slane %v660_v54, 6  ;;  %v699_v3 = vrot.slane %v660_v54, 4  ;;  %v2245_v47 = vld [vmem:[#allocation2 + $0x130] sm:$0xff] }
 0x364   :  { %v682_v4 = vsel %vm2165_vm11, %v576_v39, %v678_v58  ;;  %v690_v7 = vsel %vm2165_vm11, %v576_v39, %v686_v62  ;;  %v705_v8 = vrot.slane %v660_v54, 2  ;;  %v2181_v9 = vadd.f32 %v717_v53, %v660_v54  ;;  %v2216_v39 = vld [vmem:[#allocation2 + $0x170] sm:$0xff] }
 0x365   :  { %v1722_v10 = vmul.f32 -1.442695, %v683_v63  ;;  %v684_v6 = vadd.f32 %v682_v4, %v662_v0  ;;  %v2183_v11 = vadd.f32 %v693_v2, %v689_v61  ;;  %v694_v12 = vrot.slane %v662_v0, 6  ;;  %779 = vmatpush1.msra.mxu1 %v2216_v39  ;;  %890 = vmatpush1.msra.mxu0 %v2216_v39 }
 0x366   :  { %v2185_v13 = vadd.f32 %v699_v3, %v681_v59  ;;  %v700_v14 = vrot.slane %v662_v0, 4  ;;  %v2187_v15 = vadd.f32 %v705_v8, %v689_v61  ;;  %v706_v16 = vrot.slane %v662_v0, 2  ;;  %780 = vmatprep.subr.mxu1 %v2218_v40  ;;  %891 = vmatprep.subr.mxu0 %v2218_v40 }
 0x367   :  { %1888 = vpow2.f32 %v1722_v10  ;;  %v1723_v17 = vmul.f32 -1.442695, %v684_v6  ;;  %v2189_v18 = vadd.f32 %v694_v12, %v690_v7  ;;  %v718_v19 = vsel %vm2165_vm11, %v578_v50, %v714_v55  ;;  %781 = vmatpush1.msra.mxu1 %v2221_v41  ;;  %892 = vmatpush1.msra.mxu0 %v2221_v41 }
 0x368   :  { %v2193_v20 = vadd.f32 %v700_v14, %v682_v4  ;;  %v2195_v21 = vadd.f32 %v706_v16, %v690_v7  ;;  %v2197_v22 = vadd.f32 %v718_v19, %v662_v0  ;;  %v2199_v23 = vadd.f32 %v725_v56, %v693_v2  ;;  %782 = vmatprep.subr.mxu1 %v2225_v42 }
 0x369   :  { %1890 = vpow2.f32 %v1723_v17  ;;  %v726_v24 = vsel %vm2165_vm11, %v578_v50, %v722_v57  ;;  %v2203_v5 = vadd.f32 %v717_v53, %v699_v3  ;;  %v2205_v25 = vadd.f32 %v718_v19, %v700_v14  ;;  %893 = vmatprep.subr.mxu0 %v2225_v42  ;;  %783 = vmatpush1.msra.mxu1 %v2229_v43  ;;  %v2257_v50 = vld [vmem:[#allocation2 + $0x118] sm:$0xff]  ;;  %v2269_v53 = vld [vmem:[#allocation2 + $0x100] sm:$0xff] }
 0x36a   :  { %v2207_v26 = vadd.f32 %v726_v24, %v694_v12  ;;  %v2209_v27 = vadd.f32 %v725_v56, %v705_v8  ;;  %v2211_v28 = vadd.f32 %v726_v24, %v706_v16  ;;  %894 = vmatpush1.msra.mxu0 %v2229_v43  ;;  %784 = vmatprep.subr.mxu1 %v2233_v44 }
 0x36b   :  { %895 = vmatprep.subr.mxu0 %v2233_v44  ;;  %785 = vmatpush1.msra.mxu1 %v2237_v45 }
 0x36c   :  { %896 = vmatpush1.msra.mxu0 %v2237_v45  ;;  %786 = vmatprep.subr.mxu1 %v2241_v46 }
 0x36d   :  { %897 = vmatprep.subr.mxu0 %v2241_v46  ;;  %787 = vmatpush1.msra.mxu1 %v2245_v47 }
 0x36e   :  { %898 = vmatpush1.msra.mxu0 %v2245_v47  ;;  %788 = vmatprep.subr.mxu1 %v2249_v48 }
 0x36f   :  { %899 = vmatprep.subr.mxu0 %v2249_v48  ;;  %789 = vmatpush1.msra.mxu1 %v2253_v49 }
 0x370   :  { %900 = vmatpush1.msra.mxu0 %v2253_v49  ;;  %790 = vmatprep.subr.mxu1 %v2257_v50 }
 0x371   :  { %901 = vmatprep.subr.mxu0 %v2257_v50  ;;  %791 = vmatpush1.msra.mxu1 %v2261_v51 }
 0x372   :  { %902 = vmatpush1.msra.mxu0 %v2261_v51  ;;  %792 = vmatprep.subr.mxu1 %v2265_v52 }
 0x373   :  { %903 = vmatprep.subr.mxu0 %v2265_v52  ;;  %793 = vmatpush1.msra.mxu1 %v2269_v53 }
 0x374   :  { %v1889_v29 = vpop.eup %1888  ;;  %904 = vmatpush1.msra.mxu0 %v2269_v53  ;;  %1000 = vmatprep.subr.mxu1 %v2214_v38 }
 0x375   :  { %v739_v32 = vadd.f32 1.0, %v1889_v29  ;;  %1111 = vmatprep.subr.mxu0 %v2214_v38 }
 0x376   :  { %v1891_v30 = vpop.eup %1890 }
 0x377   :  { %v740_v31 = vadd.f32 1.0, %v1891_v30 }
 0x379   :  { %1892 = vrcp.f32 %v740_v31 }
 0x37a   :  { %1894 = vrcp.f32 %v739_v32 }
 0x386   :  { %v1893_v33 = vpop.eup %1892 }
 0x387   :  { %v745_v34 = vmul.f32 2.0, %v1893_v33  ;;  %v1895_v36 = vpop.eup %1894 }
 0x388   :  { %v747_v54 = vmul.f32 0.0, %v1895_v36 }
 0x389   :  { %v1724_v35 = vadd.f32 -1.0, %v745_v34 }
 0x38b   :  { %v748_v37 = vmul.f32 %v1895_v36, %v1724_v35 }
 0x38d   :  { %750 = vrot.lane.b32.xlu1 %v748_v37, %s2021_s14 }
 0x3ff   :  { %v751_v55 = vpop.permute.xlu1 %750 }
 0x400   :  { %v753_v56 = vadd.f32 %v751_v55, %v747_v54 }
 0x402   :  { %1896 = vtanh.f32 %v753_v56  ;;  %v856_v12 = vrot.slane %v753_v56, 6 }
 0x40f   :  { %v1897_v57 = vpop.eup %1896 }
 0x410   :  { %v755_v58 = vmul.f32 %v1897_v57, %v1893_v33 }
 0x412   :  { %757 = vrot.lane.b32.xlu0 %v755_v58, %s2021_s14 }
 0x484   :  { %v758_v59 = vpop.permute.xlu0 %757 }
 0x485   :  { %1725 = vmatmul.mubr.msk.f32.vlgmr.msra.gmra.mxu1 %vm759_vm12, %v758_v59 }
 0x486   :  { %1001 = vmatpush1.msra.mxu1 %v2216_v39  ;;  %1048 = vmatprep.mubr.f32.mxu1 %v2016_v1 }
 0x487   :  { %1002 = vmatprep.subr.mxu1 %v2218_v40 }
 0x488   :  { %1003 = vmatpush1.msra.mxu1 %v2221_v41 }
 0x489   :  { %1004 = vmatprep.subr.mxu1 %v2225_v42 }
 0x48a   :  { %1005 = vmatpush1.msra.mxu1 %v2229_v43 }
 0x48b   :  { %1006 = vmatprep.subr.mxu1 %v2233_v44 }
 0x48c   :  { %1007 = vmatpush1.msra.mxu1 %v2237_v45 }
 0x48d   :  { %1008 = vmatprep.subr.mxu1 %v2241_v46 }
 0x48e   :  { %1009 = vmatpush1.msra.mxu1 %v2245_v47 }
 0x48f   :  { %1010 = vmatprep.subr.mxu1 %v2249_v48 }
 0x490   :  { %1011 = vmatpush1.msra.mxu1 %v2253_v49 }
 0x491   :  { %1012 = vmatprep.subr.mxu1 %v2257_v50 }
 0x492   :  { %1013 = vmatpush1.msra.mxu1 %v2261_v51 }
 0x493   :  { %1014 = vmatprep.subr.mxu1 %v2265_v52 }
 0x494   :  { %1015 = vmatpush1.msra.mxu1 %v2269_v53 }
 0x495   :  { %1215 = vmatprep.subr.mxu1 %v2214_v38 }
 0x545   :  { %v828_v60 = vpop.f32.mrf.mxu1 }
 0x546   :  { %v835_v61 = vrot.slane %v828_v60, 6 }
 0x547   :  { %v830_v62 = vpop.f32.mrf.mxu1 }
 0x548   :  { %v839_v63 = vadd.f32 %v835_v61, %v2183_v11  ;;  %v836_v0 = vrot.slane %v830_v62, 6 }
 0x54a   :  { %v1726_v2 = vmul.f32 -1.442695, %v839_v63  ;;  %v840_v3 = vadd.f32 %v836_v0, %v2189_v18 }
 0x54c   :  { %1898 = vpow2.f32 %v1726_v2  ;;  %v1727_v4 = vmul.f32 -1.442695, %v840_v3 }
 0x54e   :  { %1900 = vpow2.f32 %v1727_v4 }
 0x559   :  { %v1899_v7 = vpop.eup %1898 }
 0x55a   :  { %v847_v8 = vadd.f32 1.0, %v1899_v7 }
 0x55b   :  { %v1901_v10 = vpop.eup %1900 }
 0x55c   :  { %1902 = vrcp.f32 %v847_v8  ;;  %v848_v6 = vadd.f32 1.0, %v1901_v10 }
 0x55e   :  { %1904 = vrcp.f32 %v848_v6 }
 0x569   :  { %v1903_v14 = vpop.eup %1902 }
 0x56a   :  { %v858_v16 = vmul.f32 %v1903_v14, %v856_v12 }
 0x56b   :  { %v1905_v17 = vpop.eup %1904 }
 0x56c   :  { %v853_v19 = vmul.f32 2.0, %v1905_v17 }
 0x56e   :  { %v1728_v24 = vadd.f32 -1.0, %v853_v19 }
 0x570   :  { %v859_v11 = vmul.f32 %v1903_v14, %v1728_v24 }
 0x572   :  { %861 = vrot.lane.b32.xlu1 %v859_v11, %s2021_s14 }
 0x5e4   :  { %v862_v29 = vpop.permute.xlu1 %861 }
 0x5e5   :  { %v864_v18 = vadd.f32 %v862_v29, %v858_v16 }
 0x5e7   :  { %1906 = vtanh.f32 %v864_v18  ;;  %v967_v62 = vrot.slane %v864_v18, 6 }
 0x5f4   :  { %v1907_v30 = vpop.eup %1906 }
 0x5f5   :  { %v866_v31 = vmul.f32 %v1907_v30, %v1905_v17 }
 0x5f7   :  { %v868_v32 = vrot.slane %v866_v31, 2 }
 0x5f9   :  { %869 = vrot.lane.b32.xlu1 %v868_v32, %s2021_s14 }
 0x66b   :  { %v870_v33 = vpop.permute.xlu1 %869 }
 0x66c   :  { %1729 = vmatmul.mubr.msk.f32.vlgmr.msra.gmra.mxu0 %vm759_vm12, %v870_v33 }
 0x66d   :  { %1112 = vmatpush1.msra.mxu0 %v2216_v39  ;;  %1159 = vmatprep.mubr.f32.mxu0 %v2016_v1 }
 0x66e   :  { %1113 = vmatprep.subr.mxu0 %v2218_v40 }
 0x66f   :  { %1114 = vmatpush1.msra.mxu0 %v2221_v41 }
 0x670   :  { %1115 = vmatprep.subr.mxu0 %v2225_v42 }
 0x671   :  { %1116 = vmatpush1.msra.mxu0 %v2229_v43 }
 0x672   :  { %1117 = vmatprep.subr.mxu0 %v2233_v44 }
 0x673   :  { %1118 = vmatpush1.msra.mxu0 %v2237_v45 }
 0x674   :  { %1119 = vmatprep.subr.mxu0 %v2241_v46 }
 0x675   :  { %1120 = vmatpush1.msra.mxu0 %v2245_v47 }
 0x676   :  { %1121 = vmatprep.subr.mxu0 %v2249_v48 }
 0x677   :  { %1122 = vmatpush1.msra.mxu0 %v2253_v49 }
 0x678   :  { %1123 = vmatprep.subr.mxu0 %v2257_v50 }
 0x679   :  { %1124 = vmatpush1.msra.mxu0 %v2261_v51 }
 0x67a   :  { %1125 = vmatprep.subr.mxu0 %v2265_v52 }
 0x67b   :  { %1126 = vmatpush1.msra.mxu0 %v2269_v53 }
 0x67c   :  { %1326 = vmatprep.subr.mxu0 %v2214_v38 }
 0x72c   :  { %v939_v34 = vpop.f32.mrf.mxu0 }
 0x72d   :  { %v946_v35 = vrot.slane %v939_v34, 4 }
 0x72e   :  { %v941_v36 = vpop.f32.mrf.mxu0 }
 0x72f   :  { %v950_v37 = vadd.f32 %v946_v35, %v2185_v13  ;;  %v947_v54 = vrot.slane %v941_v36, 4 }
 0x731   :  { %v1730_v55 = vmul.f32 -1.442695, %v950_v37  ;;  %v951_v56 = vadd.f32 %v947_v54, %v2193_v20 }
 0x733   :  { %1908 = vpow2.f32 %v1730_v55  ;;  %v1731_v57 = vmul.f32 -1.442695, %v951_v56 }
 0x735   :  { %1910 = vpow2.f32 %v1731_v57 }
 0x740   :  { %v1909_v58 = vpop.eup %1908 }
 0x741   :  { %v958_v59 = vadd.f32 1.0, %v1909_v58 }
 0x742   :  { %v1911_v60 = vpop.eup %1910 }
 0x743   :  { %1912 = vrcp.f32 %v958_v59  ;;  %v959_v61 = vadd.f32 1.0, %v1911_v60 }
 0x745   :  { %1914 = vrcp.f32 %v959_v61 }
 0x750   :  { %v1913_v63 = vpop.eup %1912 }
 0x751   :  { %v969_v0 = vmul.f32 %v1913_v63, %v967_v62 }
 0x752   :  { %v1915_v2 = vpop.eup %1914 }
 0x753   :  { %v964_v3 = vmul.f32 2.0, %v1915_v2 }
 0x755   :  { %v1732_v4 = vadd.f32 -1.0, %v964_v3 }
 0x757   :  { %v970_v13 = vmul.f32 %v1913_v63, %v1732_v4 }
 0x759   :  { %972 = vrot.lane.b32.xlu0 %v970_v13, %s2021_s14 }
 0x7cb   :  { %v973_v7 = vpop.permute.xlu0 %972 }
 0x7cc   :  { %v975_v20 = vadd.f32 %v973_v7, %v969_v0 }
 0x7ce   :  { %1916 = vtanh.f32 %v975_v20  ;;  %v1078_v34 = vrot.slane %v975_v20, 6 }
 0x7db   :  { %v1917_v8 = vpop.eup %1916 }
 0x7dc   :  { %v977_v10 = vmul.f32 %v1917_v8, %v1915_v2 }
 0x7de   :  { %v979_v6 = vrot.slane %v977_v10, 4 }
 0x7e0   :  { %980 = vrot.lane.b32.xlu1 %v979_v6, %s2021_s14 }
 0x852   :  { %v981_v12 = vpop.permute.xlu1 %980 }
 0x853   :  { %1733 = vmatmul.mubr.msk.f32.vlgmr.msra.gmra.mxu1 %vm759_vm12, %v981_v12 }
 0x854   :  { %1216 = vmatpush1.msra.mxu1 %v2216_v39  ;;  %1263 = vmatprep.mubr.f32.mxu1 %v2016_v1 }
 0x855   :  { %1217 = vmatprep.subr.mxu1 %v2218_v40 }
 0x856   :  { %1218 = vmatpush1.msra.mxu1 %v2221_v41 }
 0x857   :  { %1219 = vmatprep.subr.mxu1 %v2225_v42 }
 0x858   :  { %1220 = vmatpush1.msra.mxu1 %v2229_v43 }
 0x859   :  { %1221 = vmatprep.subr.mxu1 %v2233_v44 }
 0x85a   :  { %1222 = vmatpush1.msra.mxu1 %v2237_v45 }
 0x85b   :  { %1223 = vmatprep.subr.mxu1 %v2241_v46 }
 0x85c   :  { %1224 = vmatpush1.msra.mxu1 %v2245_v47 }
 0x85d   :  { %1225 = vmatprep.subr.mxu1 %v2249_v48 }
 0x85e   :  { %1226 = vmatpush1.msra.mxu1 %v2253_v49 }
 0x85f   :  { %1227 = vmatprep.subr.mxu1 %v2257_v50 }
 0x860   :  { %1228 = vmatpush1.msra.mxu1 %v2261_v51 }
 0x861   :  { %1229 = vmatprep.subr.mxu1 %v2265_v52 }
 0x862   :  { %1230 = vmatpush1.msra.mxu1 %v2269_v53 }
 0x863   :  { %1437 = vmatprep.subr.mxu1 %v2214_v38 }
 0x913   :  { %v1050_v14 = vpop.f32.mrf.mxu1 }
 0x914   :  { %v1057_v16 = vrot.slane %v1050_v14, 2 }
 0x915   :  { %v1052_v17 = vpop.f32.mrf.mxu1 }
 0x916   :  { %v1061_v19 = vadd.f32 %v1057_v16, %v2187_v15  ;;  %v1058_v24 = vrot.slane %v1052_v17, 2 }
 0x918   :  { %v1734_v11 = vmul.f32 -1.442695, %v1061_v19  ;;  %v1062_v29 = vadd.f32 %v1058_v24, %v2195_v21 }
 0x91a   :  { %1918 = vpow2.f32 %v1734_v11  ;;  %v1735_v18 = vmul.f32 -1.442695, %v1062_v29 }
 0x91c   :  { %1920 = vpow2.f32 %v1735_v18 }
 0x927   :  { %v1919_v30 = vpop.eup %1918 }
 0x928   :  { %v1069_v31 = vadd.f32 1.0, %v1919_v30 }
 0x929   :  { %v1921_v32 = vpop.eup %1920 }
 0x92a   :  { %1922 = vrcp.f32 %v1069_v31  ;;  %v1070_v33 = vadd.f32 1.0, %v1921_v32 }
 0x92c   :  { %1924 = vrcp.f32 %v1070_v33 }
 0x937   :  { %v1923_v38 = vpop.eup %1922 }
 0x938   :  { %v1080_v35 = vmul.f32 %v1923_v38, %v1078_v34 }
 0x939   :  { %v1925_v36 = vpop.eup %1924 }
 0x93a   :  { %v1075_v37 = vmul.f32 2.0, %v1925_v36 }
 0x93c   :  { %v1736_v54 = vadd.f32 -1.0, %v1075_v37 }
 0x93e   :  { %v1081_v15 = vmul.f32 %v1923_v38, %v1736_v54 }
 0x940   :  { %1083 = vrot.lane.b32.xlu0 %v1081_v15, %s2021_s14 }
 0x9b2   :  { %v1084_v55 = vpop.permute.xlu0 %1083 }
 0x9b3   :  { %v1086_v21 = vadd.f32 %v1084_v55, %v1080_v35 }
 0x9b5   :  { %1926 = vtanh.f32 %v1086_v21  ;;  %v1183_v20 = vrot.slane %v1086_v21, 6 }
 0x9c2   :  { %v1927_v56 = vpop.eup %1926 }
 0x9c3   :  { %v1088_v57 = vmul.f32 %v1927_v56, %v1925_v36 }
 0x9c5   :  { %v1090_v58 = vrot.slane %v1088_v57, 6 }
 0x9c7   :  { %1091 = vrot.lane.b32.xlu1 %v1090_v58, %s2021_s14 }
 0xa39   :  { %v1092_v59 = vpop.permute.xlu1 %1091 }
 0xa3a   :  { %1737 = vmatmul.mubr.msk.f32.vlgmr.msra.gmra.mxu0 %vm759_vm12, %v1092_v59 }
 0xa3b   :  { %1327 = vmatpush1.msra.mxu0 %v2216_v39  ;;  %1374 = vmatprep.mubr.f32.mxu0 %v2016_v1 }
 0xa3c   :  { %1328 = vmatprep.subr.mxu0 %v2218_v40 }
 0xa3d   :  { %1329 = vmatpush1.msra.mxu0 %v2221_v41 }
 0xa3e   :  { %1330 = vmatprep.subr.mxu0 %v2225_v42 }
 0xa3f   :  { %1331 = vmatpush1.msra.mxu0 %v2229_v43 }
 0xa40   :  { %1332 = vmatprep.subr.mxu0 %v2233_v44 }
 0xa41   :  { %1333 = vmatpush1.msra.mxu0 %v2237_v45 }
 0xa42   :  { %1334 = vmatprep.subr.mxu0 %v2241_v46 }
 0xa43   :  { %1335 = vmatpush1.msra.mxu0 %v2245_v47 }
 0xa44   :  { %1336 = vmatprep.subr.mxu0 %v2249_v48 }
 0xa45   :  { %1337 = vmatpush1.msra.mxu0 %v2253_v49 }
 0xa46   :  { %1338 = vmatprep.subr.mxu0 %v2257_v50 }
 0xa47   :  { %1339 = vmatpush1.msra.mxu0 %v2261_v51 }
 0xa48   :  { %1340 = vmatprep.subr.mxu0 %v2265_v52 }
 0xa49   :  { %1341 = vmatpush1.msra.mxu0 %v2269_v53 }
 0xa4a   :  { %1824 = vmatprep.subr.mxu0 %v2016_v1 }
 0xafa   :  { %v1161_v60 = vpop.f32.mrf.mxu0 }
 0xafb   :  { %v1166_v61 = vadd.f32 %v1161_v60, %v2181_v9 }
 0xafc   :  { %v1163_v62 = vpop.f32.mrf.mxu0 }
 0xafd   :  { %v1738_v63 = vmul.f32 -1.442695, %v1166_v61  ;;  %v1167_v0 = vadd.f32 %v1163_v62, %v2197_v22 }
 0xaff   :  { %1928 = vpow2.f32 %v1738_v63  ;;  %v1739_v2 = vmul.f32 -1.442695, %v1167_v0 }
 0xb01   :  { %1930 = vpow2.f32 %v1739_v2 }
 0xb0c   :  { %v1929_v3 = vpop.eup %1928 }
 0xb0d   :  { %v1174_v4 = vadd.f32 1.0, %v1929_v3 }
 0xb0e   :  { %v1931_v13 = vpop.eup %1930 }
 0xb0f   :  { %1932 = vrcp.f32 %v1174_v4  ;;  %v1175_v7 = vadd.f32 1.0, %v1931_v13 }
 0xb11   :  { %1934 = vrcp.f32 %v1175_v7 }
 0xb1c   :  { %v1933_v8 = vpop.eup %1932 }
 0xb1d   :  { %v1185_v10 = vmul.f32 %v1933_v8, %v1183_v20 }
 0xb1e   :  { %v1935_v6 = vpop.eup %1934 }
 0xb1f   :  { %v1180_v12 = vmul.f32 2.0, %v1935_v6 }
 0xb21   :  { %v1740_v14 = vadd.f32 -1.0, %v1180_v12 }
 0xb23   :  { %v1186_v9 = vmul.f32 %v1933_v8, %v1740_v14 }
 0xb25   :  { %1188 = vrot.lane.b32.xlu0 %v1186_v9, %s2021_s14 }
 0xb97   :  { %v1189_v16 = vpop.permute.xlu0 %1188 }
 0xb98   :  { %v1191_v22 = vadd.f32 %v1189_v16, %v1185_v10 }
 0xb9a   :  { %1936 = vtanh.f32 %v1191_v22 }
 0xba7   :  { %v1937_v17 = vpop.eup %1936 }
 0xba8   :  { %v1193_v19 = vmul.f32 %v1937_v17, %v1935_v6 }
 0xbaa   :  { %1195 = vrot.lane.b32.xlu1 %v1193_v19, %s2021_s14 }
 0xc1c   :  { %v1196_v24 = vpop.permute.xlu1 %1195 }
 0xc1d   :  { %1741 = vmatmul.mubr.msk.f32.vlgmr.msra.gmra.mxu1 %vm759_vm12, %v1196_v24 }
 0xc1e   :  { %1438 = vmatpush1.msra.mxu1 %v2216_v39  ;;  %1485 = vmatprep.mubr.f32.mxu1 %v2016_v1 }
 0xc1f   :  { %1439 = vmatprep.subr.mxu1 %v2218_v40 }
 0xc20   :  { %1440 = vmatpush1.msra.mxu1 %v2221_v41 }
 0xc21   :  { %1441 = vmatprep.subr.mxu1 %v2225_v42 }
 0xc22   :  { %1442 = vmatpush1.msra.mxu1 %v2229_v43 }
 0xc23   :  { %1443 = vmatprep.subr.mxu1 %v2233_v44 }
 0xc24   :  { %1444 = vmatpush1.msra.mxu1 %v2237_v45 }
 0xc25   :  { %1445 = vmatprep.subr.mxu1 %v2241_v46 }
 0xc26   :  { %1446 = vmatpush1.msra.mxu1 %v2245_v47 }
 0xc27   :  { %1447 = vmatprep.subr.mxu1 %v2249_v48 }
 0xc28   :  { %1448 = vmatpush1.msra.mxu1 %v2253_v49 }
 0xc29   :  { %1449 = vmatprep.subr.mxu1 %v2257_v50 }
 0xc2a   :  { %1450 = vmatpush1.msra.mxu1 %v2261_v51  ;;  %v1293_v51 = vrot.slane %v1191_v22, 6 }
 0xc2b   :  { %1451 = vmatprep.subr.mxu1 %v2265_v52 }
 0xc2c   :  { %1452 = vmatpush1.msra.mxu1 %v2269_v53 }
 0xc2d   :  { %1859 = vmatprep.subr.mxu1 %v2016_v1 }
 0xcdd   :  { %v1265_v39 = vpop.f32.mrf.mxu1 }
 0xcde   :  { %v1272_v40 = vrot.slane %v1265_v39, 6 }
 0xcdf   :  { %v1267_v41 = vpop.f32.mrf.mxu1 }
 0xce0   :  { %v1276_v42 = vadd.f32 %v1272_v40, %v2199_v23  ;;  %v1273_v43 = vrot.slane %v1267_v41, 6 }
 0xce2   :  { %v1742_v44 = vmul.f32 -1.442695, %v1276_v42  ;;  %v1277_v45 = vadd.f32 %v1273_v43, %v2207_v26 }
 0xce4   :  { %1938 = vpow2.f32 %v1742_v44  ;;  %v1743_v46 = vmul.f32 -1.442695, %v1277_v45 }
 0xce6   :  { %1940 = vpow2.f32 %v1743_v46  ;;  %v110_v46 = vld [vmem:[%s2495_s2 + $0xc0] sm:$0xff] }
 0xcf1   :  { %v1939_v47 = vpop.eup %1938 }
 0xcf2   :  { %v1284_v48 = vadd.f32 1.0, %v1939_v47  ;;  %v109_v47 = vld [vmem:[%s2495_s2 + $0xb8] sm:$0xff] }
 0xcf3   :  { %v1941_v49 = vpop.eup %1940 }
 0xcf4   :  { %1942 = vrcp.f32 %v1284_v48  ;;  %v1285_v50 = vadd.f32 1.0, %v1941_v49  ;;  %v108_v48 = vld [vmem:[%s2495_s2 + $0xb0] sm:$0xff]  ;;  %v107_v49 = vld [vmem:[%s2495_s2 + $0xa8] sm:$0xff] }
 0xcf6   :  { %1944 = vrcp.f32 %v1285_v50  ;;  %v106_v50 = vld [vmem:[%s2495_s2 + $0xa0] sm:$0xff] }
 0xd01   :  { %v1943_v52 = vpop.eup %1942 }
 0xd02   :  { %v1295_v53 = vmul.f32 %v1943_v52, %v1293_v51  ;;  %v105_v51 = vld [vmem:[%s2495_s2 + $0x98] sm:$0xff] }
 0xd03   :  { %v1945_v11 = vpop.eup %1944 }
 0xd04   :  { %v1290_v29 = vmul.f32 2.0, %v1945_v11 }
 0xd06   :  { %v1744_v18 = vadd.f32 -1.0, %v1290_v29  ;;  %v101_v29 = vld [vmem:[%s2495_s2 + $0x78] sm:$0xff] }
 0xd08   :  { %v1296_v23 = vmul.f32 %v1943_v52, %v1744_v18  ;;  %v104_v52 = vld [vmem:[%s2495_s2 + $0x90] sm:$0xff] }
 0xd09   :  { %v100_v18 = vld [vmem:[%s2495_s2 + $0x70] sm:$0xff] }
 0xd0a   :  { %1298 = vrot.lane.b32.xlu0 %v1296_v23, %s2021_s14  ;;  %v99_v23 = vld [vmem:[%s2495_s2 + $0x68] sm:$0xff] }
 0xd7c   :  { %v1299_v30 = vpop.permute.xlu0 %1298 }
 0xd7d   :  { %v1301_v26 = vadd.f32 %v1299_v30, %v1295_v53  ;;  %v103_v53 = vld [vmem:[%s2495_s2 + $0x88] sm:$0xff]  ;;  %v98_v30 = vld [vmem:[%s2495_s2 + $0x60] sm:$0xff] }
 0xd7f   :  { %1946 = vtanh.f32 %v1301_v26  ;;  %v1404_v60 = vrot.slane %v1301_v26, 6 }
 0xd8c   :  { %v1947_v31 = vpop.eup %1946 }
 0xd8d   :  { %v1303_v32 = vmul.f32 %v1947_v31, %v1945_v11  ;;  %v102_v11 = vld [vmem:[%s2495_s2 + $0x80] sm:$0xff] }
 0xd8f   :  { %v1305_v33 = vrot.slane %v1303_v32, 2  ;;  %v97_v32 = vld [vmem:[%s2495_s2 + $0x58] sm:$0xff] }
 0xd91   :  { %1306 = vrot.lane.b32.xlu1 %v1305_v33, %s2021_s14  ;;  %v96_v33 = vld [vmem:[%s2495_s2 + $0x50] sm:$0xff] }
 0xe03   :  { %v1307_v34 = vpop.permute.xlu1 %1306 }
 0xe04   :  { %1745 = vmatmul.mubr.msk.f32.vlgmr.msra.gmra.mxu0 %vm759_vm12, %v1307_v34  ;;  %v116_v34 = vld [vmem:[%s2495_s2 + $0xf0] sm:$0xff] }
 0xe05   :  { %1856 = vmatprep.mubr.msk.f32.mxu0 %vm2017_vm0, %v2016_v1 }
 0xec4   :  { %v1376_v38 = vpop.f32.mrf.mxu0 }
 0xec5   :  { %v1383_v35 = vrot.slane %v1376_v38, 4  ;;  %v115_v38 = vld [vmem:[%s2495_s2 + $0xe8] sm:$0xff] }
 0xec6   :  { %v1378_v36 = vpop.f32.mrf.mxu0 }
 0xec7   :  { %v1387_v37 = vadd.f32 %v1383_v35, %v2203_v5  ;;  %v1384_v54 = vrot.slane %v1378_v36, 4 }
 0xec9   :  { %v1746_v15 = vmul.f32 -1.442695, %v1387_v37  ;;  %v1388_v55 = vadd.f32 %v1384_v54, %v2205_v25 }
 0xecb   :  { %1948 = vpow2.f32 %v1746_v15  ;;  %v1747_v21 = vmul.f32 -1.442695, %v1388_v55  ;;  %v114_v55 = vld [vmem:[%s2495_s2 + $0xe0] sm:$0xff] }
 0xecd   :  { %1950 = vpow2.f32 %v1747_v21  ;;  %v113_v21 = vld [vmem:[%s2495_s2 + $0xd8] sm:$0xff] }
 0xed8   :  { %v1949_v56 = vpop.eup %1948 }
 0xed9   :  { %v1395_v57 = vadd.f32 1.0, %v1949_v56  ;;  %v1753_v56 = vld [vmem:[%s2495_s2 + $0xd0] ss:$0 sm:$0xff] }
 0xeda   :  { %v1951_v58 = vpop.eup %1950 }
 0xedb   :  { %1952 = vrcp.f32 %v1395_v57  ;;  %v1396_v59 = vadd.f32 1.0, %v1951_v58 }
 0xedd   :  { %1954 = vrcp.f32 %v1396_v59 }
 0xee8   :  { %v1953_v61 = vpop.eup %1952 }
 0xee9   :  { %v1406_v62 = vmul.f32 %v1953_v61, %v1404_v60  ;;  %v1754_v60 = vld [vmem:[%s2495_s2 + $0xf8] ss:$0 sm:$0xff] }
 0xeea   :  { %v1955_v63 = vpop.eup %1954 }
 0xeeb   :  { %v1401_v0 = vmul.f32 2.0, %v1955_v63 }
 0xeed   :  { %v1748_v2 = vadd.f32 -1.0, %v1401_v0 }
 0xeef   :  { %v1407_v5 = vmul.f32 %v1953_v61, %v1748_v2 }
 0xef1   :  { %1409 = vrot.lane.b32.xlu0 %v1407_v5, %s2021_s14 }
 0xf63   :  { %v1410_v3 = vpop.permute.xlu0 %1409 }
 0xf64   :  { %v1412_v25 = vadd.f32 %v1410_v3, %v1406_v62 }
 0xf66   :  { %1956 = vtanh.f32 %v1412_v25  ;;  %v1515_v40 = vrot.slane %v1412_v25, 6 }
 0xf73   :  { %v1957_v4 = vpop.eup %1956 }
 0xf74   :  { %v1414_v13 = vmul.f32 %v1957_v4, %v1955_v63 }
 0xf76   :  { %v1416_v7 = vrot.slane %v1414_v13, 4 }
 0xf78   :  { %1417 = vrot.lane.b32.xlu1 %v1416_v7, %s2021_s14 }
 0xfea   :  { %v1418_v20 = vpop.permute.xlu1 %1417 }
 0xfeb   :  { %1749 = vmatmul.mubr.msk.f32.vlgmr.msra.gmra.mxu1 %vm759_vm12, %v1418_v20 }
 0xfec   :  { %1867 = vmatprep.mubr.msk.f32.mxu1 %vm2017_vm0, %v2016_v1  ;;  %1860 = vmatpush3.msra.mxu1 %v116_v34 }
 0xfed   :  { %1861 = vmatprep.subr.mxu1 %v2016_v1 }
 0xfee   :  { %1862 = vmatpush3.msra.mxu1 %v115_v38 }
 0xfef   :  { %1863 = vmatprep.subr.mxu1 %v2016_v1 }
 0xff0   :  { %1864 = vmatpush3.msra.mxu1 %v114_v55 }
 0xff1   :  { %1865 = vmatprep.subr.mxu1 %v2016_v1 }
 0xff2   :  { %1866 = vmatpush3.msra.mxu1 %v113_v21 }
0x10ab   :  { %v1487_v8 = vpop.f32.mrf.mxu1 }
0x10ac   :  { %v1494_v10 = vrot.slane %v1487_v8, 2 }
0x10ad   :  { %v1489_v6 = vpop.f32.mrf.mxu1 }
0x10ae   :  { %v1498_v12 = vadd.f32 %v1494_v10, %v2209_v27  ;;  %v1495_v14 = vrot.slane %v1489_v6, 2 }
0x10b0   :  { %v1750_v9 = vmul.f32 -1.442695, %v1498_v12  ;;  %v1499_v16 = vadd.f32 %v1495_v14, %v2211_v28  ;;  %v111_v28 = vld [vmem:[%s2495_s2 + $0xc8] sm:$0xff] }
0x10b1   :  { %1825 = vmatpush3.msra.mxu0 %v111_v28 }
0x10b2   :  { %1958 = vpow2.f32 %v1750_v9  ;;  %v1751_v22 = vmul.f32 -1.442695, %v1499_v16  ;;  %1826 = vmatprep.subr.mxu0 %v2016_v1 }
0x10b3   :  { %1827 = vmatpush3.msra.mxu0 %v110_v46 }
0x10b4   :  { %1960 = vpow2.f32 %v1751_v22  ;;  %1828 = vmatprep.subr.mxu0 %v2016_v1 }
0x10b5   :  { %1829 = vmatpush3.msra.mxu0 %v109_v47 }
0x10b6   :  { %1830 = vmatprep.subr.mxu0 %v2016_v1 }
0x10b7   :  { %1831 = vmatpush3.msra.mxu0 %v108_v48 }
0x10b8   :  { %1832 = vmatprep.subr.mxu0 %v2016_v1 }
0x10b9   :  { %1833 = vmatpush3.msra.mxu0 %v107_v49 }
0x10ba   :  { %1834 = vmatprep.subr.mxu0 %v2016_v1 }
0x10bb   :  { %1835 = vmatpush3.msra.mxu0 %v106_v50 }
0x10bc   :  { %1836 = vmatprep.subr.mxu0 %v2016_v1 }
0x10bd   :  { %1837 = vmatpush3.msra.mxu0 %v105_v51 }
0x10be   :  { %1838 = vmatprep.subr.mxu0 %v2016_v1 }
0x10bf   :  { %v1959_v17 = vpop.eup %1958  ;;  %1839 = vmatpush3.msra.mxu0 %v104_v52 }
0x10c0   :  { %v1506_v19 = vadd.f32 1.0, %v1959_v17  ;;  %1840 = vmatprep.subr.mxu0 %v2016_v1 }
0x10c1   :  { %v1961_v24 = vpop.eup %1960  ;;  %1841 = vmatpush3.msra.mxu0 %v103_v53 }
0x10c2   :  { %1962 = vrcp.f32 %v1506_v19  ;;  %v1507_v39 = vadd.f32 1.0, %v1961_v24  ;;  %1842 = vmatprep.subr.mxu0 %v2016_v1 }
0x10c3   :  { %1843 = vmatpush3.msra.mxu0 %v102_v11 }
0x10c4   :  { %1964 = vrcp.f32 %v1507_v39  ;;  %1844 = vmatprep.subr.mxu0 %v2016_v1 }
0x10c5   :  { %1845 = vmatpush3.msra.mxu0 %v101_v29 }
0x10c6   :  { %1846 = vmatprep.subr.mxu0 %v2016_v1 }
0x10c7   :  { %1847 = vmatpush3.msra.mxu0 %v100_v18 }
0x10c8   :  { %1848 = vmatprep.subr.mxu0 %v2016_v1 }
0x10c9   :  { %1849 = vmatpush3.msra.mxu0 %v99_v23 }
0x10ca   :  { %1850 = vmatprep.subr.mxu0 %v2016_v1 }
0x10cb   :  { %1851 = vmatpush3.msra.mxu0 %v98_v30 }
0x10cc   :  { %1852 = vmatprep.subr.mxu0 %v2016_v1 }
0x10cd   :  { %1853 = vmatpush3.msra.mxu0 %v97_v32 }
0x10ce   :  { %1854 = vmatprep.subr.mxu0 %v2016_v1 }
0x10cf   :  { %v1963_v41 = vpop.eup %1962  ;;  %1855 = vmatpush3.msra.mxu0 %v96_v33 }
0x10d0   :  { %v1517_v42 = vmul.f32 %v1963_v41, %v1515_v40 }
0x10d1   :  { %v1965_v43 = vpop.eup %1964 }
0x10d2   :  { %v1512_v44 = vmul.f32 2.0, %v1965_v43 }
0x10d4   :  { %v1752_v45 = vadd.f32 -1.0, %v1512_v44 }
0x10d6   :  { %v1518_v27 = vmul.f32 %v1963_v41, %v1752_v45 }
0x10d8   :  { %1520 = vrot.lane.b32.xlu0 %v1518_v27, %s2021_s14 }
0x114a   :  { %v1521_v26 = vpop.permute.xlu0 %1520 }
0x114b   :  { %v1523_v31 = vadd.f32 %v1521_v26, %v1517_v42 }
0x114d   :  { %1966 = vtanh.f32 %v1523_v31 }
0x115a   :  { %v1967_v35 = vpop.eup %1966 }
0x115b   :  { %v1525_v36 = vmul.f32 %v1967_v35, %v1965_v43 }
0x115d   :  { %1527 = vrot.lane.b32.xlu1 %v1525_v36, %s2021_s14 }
0x11cf   :  { %v1528_v37 = vpop.permute.xlu1 %1527 }
0x11d0   :  { %v1530_v54 = vsel %vm759_vm12, %v1528_v37, %v1523_v31 }
0x11d1   :  { %v1536_v15 = vrot.slane %v1530_v54, 6 }
0x11d3   :  { %1857 = vmatmul.mubr.f32.vlgmr.msra.gmra.mxu0 %v1536_v15 }
0x1293   :  { %v1604_v57 = vpop.f32.mrf.mxu0 }
0x1294   :  { %v1605_v58 = vadd.f32 %v1753_v56, %v1604_v57 }
0x1295   :  { %v1858_v59 = vpop.f32.mrf.mxu0 }
0x1296   :  { %1868 = vmatmul.mubr.msk.f32.vlgmr.msra.gmra.mxu1 %vm1612_vm13, %v1605_v58 }
0x1356   :  { %v1682_v61 = vpop.f32.mrf.mxu1 }
0x1357   :  { %v1683_v62 = vadd.f32 %v1754_v60, %v1682_v61 }
0x1358   :  { %v1869_v1 = vpop.f32.mrf.mxu1 }
0x1359   :  { %1687 = vst.msk [vmem:[#allocation5] sm:$0x3] %vm1686_vm14, %v1683_v62 }
0x135a   :  { %1999 = shalt.err (!%p1996_p9)
}
0x135b   :  { %1697 = dma.vmem_to_hbm [thread:$0]  %s1695_s29, 32, %s2496_s3, [#allocation4]  }
0x135c   :  { %2010 = dma.done.wait [#allocation4], 32  }
0x135d   :  { %2011 = vsyncadd [#allocation4], 4294967264 }
0x135e   :  { %1701 = vsyncpa [#allocation3], 1 }
0x135f   :  { %1702 = vsyncpa [#allocation4], 1 }

</bundles_post_ra>
